<compile_context>
chip_gen: v5e
topology: v5e:2x2
jax: 0.10.0
libtpu: 0.0.40
codegen_flags: <defaults>
</compile_context>

<pallas_src>
import numpy as np
import jax
import jax.numpy as jnp
from jax.experimental import pallas as pl
from jax.experimental.pallas import tpu as pltpu


# ----------------------------------------------------------------------------
# MADE mask construction (natural input ordering, degrees 1..in_num).
# Hidden masks use >=, the output mask uses strict > (autoregressive property).
# TODO(synk): confirm this matches the user's MADEMLP degree convention; masks
# are baked into the weights at prep time, so any mask convention plugs in here.
# ----------------------------------------------------------------------------
def made_masks(in_num: int, width: int, depth: int):
    m_prev = np.arange(1, in_num + 1)                      # input degrees
    hidden_masks = []
    for _ in range(depth):
        m_h = (np.arange(width) % max(in_num - 1, 1)) + 1  # hidden degrees
        hidden_masks.append((m_h[:, None] >= m_prev[None, :]).astype(np.float32))
        m_prev = m_h
    m_out = np.arange(1, in_num + 1)                       # one degree per site
    out_mask = (m_out[:, None] > m_prev[None, :]).astype(np.float32)
    return hidden_masks, out_mask


# ----------------------------------------------------------------------------
# Parameter preparation (grid-invariant work hoisted out of the kernel):
#   - fold masks into weights, transpose to (in_features, out_features)
#   - build the interleaved "difference" output weight/bias:
#       col 2i   = (wb - wa) column i   -> d = y1 - y0 on channel-0 lanes
#       col 2i+1 = (wa - wb) column i   -> d = y0 - y1 on channel-1 lanes
#   - cast matmul operands to the MXU compute dtype (bf16 default; pass
#     compute_dtype=jnp.float32 on v5e where bf16 VPU/EUP casts are pure cost)
# ----------------------------------------------------------------------------
def prepare_params(params, depth, compute_dtype=jnp.bfloat16):
    hidden_w, hidden_b = [], []
    for l in range(depth):
        w = (params[f"w{l}"] * params[f"mask{l}"]).T               # (in, out)
        hidden_w.append(jnp.asarray(w, compute_dtype))
        hidden_b.append(jnp.asarray(params[f"b{l}"], jnp.float32).reshape(1, -1))

    waT = (params["wa"] * params["mask_out"]).T                     # (width, in_num)
    wbT = (params["wb"] * params["mask_out"]).T
    width_eff, in_num = waT.shape
    wd = jnp.stack([wbT - waT, waT - wbT], axis=-1).reshape(width_eff, 2 * in_num)
    ba = jnp.asarray(params["ba"], jnp.float32).reshape(-1)
    bb = jnp.asarray(params["bb"], jnp.float32).reshape(-1)
    bd = jnp.stack([bb - ba, ba - bb], axis=-1).reshape(1, 2 * in_num)

    return {"hidden_w": tuple(hidden_w), "hidden_b": tuple(hidden_b),
            "wd": wd.astype(compute_dtype), "bd": bd.astype(jnp.float32)}


# ----------------------------------------------------------------------------
# Pallas kernel factory: masked MLP of arbitrary depth + log-abs normalizer.
# ----------------------------------------------------------------------------
def _make_kernel(depth):
    def kernel(*refs):
        x_ref = refs[0]
        hidden = refs[1:1 + 2 * depth]
        wd_ref, bd_ref, out_ref = refs[1 + 2 * depth:]
        cdt = wd_ref.dtype                                   # matmul operand dtype

        h = x_ref[...]
        if h.dtype != cdt:
            h = h.astype(cdt)
        # TODO(synk): activations are user-configurable in the PyTorch module;
        # tanh (the standard choice for this ansatz) is assumed here.
        for l in range(depth):
            w_ref, b_ref = hidden[2 * l], hidden[2 * l + 1]
            z = jnp.dot(h, w_ref[...], preferred_element_type=jnp.float32) + b_ref[...]
            h = jnp.tanh(z)
            if cdt != jnp.float32:
                h = h.astype(cdt)

        # d[:, j] = y_partner(j) - y_j, already in interleaved (site, channel)
        # lane order thanks to the pre-built difference weight.
        d = jnp.dot(h, wd_ref[...], preferred_element_type=jnp.float32) + bd_ref[...]

        # out_j = y_j - 0.5*logsumexp(2*y_j, 2*y_partner)
        #       = -relu(d_j) - 0.5*log1p(exp(-2*|d_j|))
        out = -(jnp.maximum(d, 0.0) + 0.5 * jnp.log1p(jnp.exp(-2.0 * jnp.abs(d))))
        out_ref[...] = out.astype(out_ref.dtype)

    return kernel


def _round_up(x, m):
    return ((x + m - 1) // m) * m


# ----------------------------------------------------------------------------
# Wrapper
# ----------------------------------------------------------------------------
def log_abs_made_mlp(x, prepared, *, batch_tile=None):
    """x: (B, in_num) -> (B, in_num, 2) float32 normalized log-amplitudes."""
    B, in_num = x.shape
    depth = len(prepared["hidden_w"])
    wd, bd = prepared["wd"], prepared["bd"]
    two_n = wd.shape[1]
    assert two_n == 2 * in_num

    # Tile selection: large tiles amortize per-grid-step overhead; multiple of
    # 16 sublanes (bf16-friendly); keep >= 2 grid steps when possible so v7x's
    # two TensorCores both get work and the pipeline can overlap; rebalance so
    # padding waste stays small.
    if batch_tile is None:
        batch_tile = 2048
    tb = max(16, _round_up(batch_tile, 16))
    if B > 16:
        tb = min(tb, _round_up(-(-B // 2), 16))        # ensure >= 2 grid steps
    steps = -(-B // tb)
    tb = _round_up(-(-B // steps), 16)                 # balance -> small padding
    Bp = tb * steps

    # ±1 spin inputs are exact in bf16 -> stream x at the compute dtype
    # (halves input DMA bytes at zero precision cost).
    x = x.astype(wd.dtype)
    if Bp != B:
        x = jnp.pad(x, ((0, Bp - B), (0, 0)))

    stream = lambda i: (i, 0)    # activations / outputs: stream over batch
    whole = lambda i: (0, 0)     # weights / biases: constant block, stays resident

    in_specs = [pl.BlockSpec((tb, in_num), stream)]
    args = [x]
    for w, b in zip(prepared["hidden_w"], prepared["hidden_b"]):
        in_specs.append(pl.BlockSpec(w.shape, whole))
        in_specs.append(pl.BlockSpec(b.shape, whole))
        args.extend([w, b])
    in_specs.append(pl.BlockSpec(wd.shape, whole))
    in_specs.append(pl.BlockSpec(bd.shape, whole))
    args.extend([wd, bd])

    # Advisory cost estimate for the XLA scheduler.
    dims = [in_num] + [w.shape[1] for w in prepared["hidden_w"]]
    mm_flops = sum(dims[i] * dims[i + 1] for i in range(len(dims) - 1)) + dims[-1] * two_n
    flops = 2 * Bp * mm_flops
    transc = Bp * (sum(dims[1:]) + 2 * two_n)
    bytes_accessed = (Bp * in_num * x.dtype.itemsize + Bp * two_n * 4
                      + sum(int(np.prod(a.shape)) * a.dtype.itemsize for a in args[1:]))

    y = pl.pallas_call(
        _make_kernel(depth),
        out_shape=jax.ShapeDtypeStruct((Bp, two_n), jnp.float32),
        grid_spec=pltpu.PrefetchScalarGridSpec(
            num_scalar_prefetch=0,
            grid=(steps,),
            in_specs=in_specs,
            out_specs=pl.BlockSpec((tb, two_n), stream),
        ),
        compiler_params=pltpu.CompilerParams(
            dimension_semantics=("parallel",),          # megacore-shardable on v7x
        ),
        cost_estimate=pl.CostEstimate(flops=int(flops),
                                      transcendentals=int(transc),
                                      bytes_accessed=int(bytes_accessed)),
    )(*args)

    # Output columns are already interleaved (out0_0, out1_0, out0_1, ...) so
    # this reshape to the module's (B, in_num, 2) convention is a free byte
    # view -- no extra HBM pass.
    return y[:B].reshape(B, in_num, 2)


# ----------------------------------------------------------------------------
# Pure-JAX f32 reference (module semantics) for verification.
# ----------------------------------------------------------------------------
def _reference(x, params, depth):
    h = x.astype(jnp.float32)
    for l in range(depth):
        h = jnp.tanh(h @ (params[f"w{l}"] * params[f"mask{l}"]).T + params[f"b{l}"])
    y0 = h @ (params["wa"] * params["mask_out"]).T + params["ba"]
    y1 = h @ (params["wb"] * params["mask_out"]).T + params["bb"]
    y = jnp.stack([y0, y1], axis=-1)                       # (B, in_num, 2)
    return y - 0.5 * jax.nn.logsumexp(2.0 * y, axis=-1, keepdims=True)


if __name__ == "__main__":
    # Small shapes consistent with the module (depth=2 hidden layers); batch
    # large enough that the wrapper picks 2 parallel grid steps (512 -> tb=256).
    B, IN_NUM, WIDTH, DEPTH = 512, 16, 64, 2

    hidden_masks, out_mask = made_masks(IN_NUM, WIDTH, DEPTH)

    key = jax.random.PRNGKey(0)
    k = jax.random.split(key, 9)
    f32 = jnp.float32
    params = {
        "w0": jax.random.normal(k[0], (WIDTH, IN_NUM), f32) / np.sqrt(IN_NUM),
        "b0": jax.random.normal(k[1], (1, WIDTH), f32) * 0.01,
        "mask0": jnp.asarray(hidden_masks[0]),
        "w1": jax.random.normal(k[2], (WIDTH, WIDTH), f32) / np.sqrt(WIDTH),
        "b1": jax.random.normal(k[3], (1, WIDTH), f32) * 0.01,
        "mask1": jnp.asarray(hidden_masks[1]),
        "wa": jax.random.normal(k[4], (IN_NUM, WIDTH), f32) / np.sqrt(WIDTH),
        "wb": jax.random.normal(k[5], (IN_NUM, WIDTH), f32) / np.sqrt(WIDTH),
        "ba": jax.random.normal(k[6], (1, IN_NUM), f32) * 0.01,
        "bb": jax.random.normal(k[7], (1, IN_NUM), f32) * 0.01,
        "mask_out": jnp.asarray(out_mask),
    }

    # +/-1 spin-like inputs (typical MADE ansatz input)
    x = jnp.sign(jax.random.normal(k[8], (B, IN_NUM), f32)).astype(f32)
    x = jnp.where(x == 0, 1.0, x)

    prepared = prepare_params(params, DEPTH, compute_dtype=jnp.bfloat16)
    out = log_abs_made_mlp(x, prepared)
    out = jax.block_until_ready(out)

    ref = _reference(x, params, DEPTH)
    # bf16 matmul operands (f32 accumulation) -> loosened tolerance vs f32 ref.
    np.testing.assert_allclose(np.asarray(out), np.asarray(ref), rtol=5e-2, atol=5e-2)
    # normalization check: sum_k exp(2 * log_abs)[..., k] == 1 (exact in f32)
    np.testing.assert_allclose(
        np.sum(np.exp(2.0 * np.asarray(out)), axis=-1), 1.0, rtol=1e-5, atol=1e-5
    )

    print("KERNEL_OK")
</pallas_src>

<mosaic_0001>
module attributes {stable_mosaic.version = 11 : i64} {
  func.func @kernel(%arg0: i32, %arg1: memref<256x16xbf16, #tpu.memory_space<vmem>>, %arg2: memref<16x64xbf16, #tpu.memory_space<vmem>>, %arg3: memref<1x64xf32, #tpu.memory_space<vmem>>, %arg4: memref<64x64xbf16, #tpu.memory_space<vmem>>, %arg5: memref<1x64xf32, #tpu.memory_space<vmem>>, %arg6: memref<64x32xbf16, #tpu.memory_space<vmem>>, %arg7: memref<1x32xf32, #tpu.memory_space<vmem>>, %arg8: memref<256x32xf32, #tpu.memory_space<vmem>>) attributes {dimension_semantics = [#tpu.dimension_semantics<parallel>], iteration_bounds = array<i64: 2>, scalar_prefetch = 0 : i64, scratch_operands = 0 : i64, tpu.core_type = #tpu.core_type<tc>, window_params = [{transform_indices = @transform_0, window_bounds = array<i64: 256, 16>}, {pipeline_mode = #tpu.pipeline_mode<synchronous>, transform_indices = @transform_1, window_bounds = array<i64: 16, 64>}, {pipeline_mode = #tpu.pipeline_mode<synchronous>, transform_indices = @transform_2, window_bounds = array<i64: 1, 64>}, {pipeline_mode = #tpu.pipeline_mode<synchronous>, transform_indices = @transform_3, window_bounds = array<i64: 64, 64>}, {pipeline_mode = #tpu.pipeline_mode<synchronous>, transform_indices = @transform_4, window_bounds = array<i64: 1, 64>}, {pipeline_mode = #tpu.pipeline_mode<synchronous>, transform_indices = @transform_5, window_bounds = array<i64: 64, 32>}, {pipeline_mode = #tpu.pipeline_mode<synchronous>, transform_indices = @transform_6, window_bounds = array<i64: 1, 32>}, {transform_indices = @transform_7, window_bounds = array<i64: 256, 32>}]} {
    %c0 = arith.constant 0 : index
    %c0_0 = arith.constant 0 : index
    %0 = vector.load %arg1[%c0, %c0_0] : memref<256x16xbf16, #tpu.memory_space<vmem>>, vector<256x16xbf16>
    %c0_1 = arith.constant 0 : index
    %c0_2 = arith.constant 0 : index
    %1 = vector.load %arg2[%c0_1, %c0_2] : memref<16x64xbf16, #tpu.memory_space<vmem>>, vector<16x64xbf16>
    %cst = arith.constant dense<0.000000e+00> : vector<256x64xf32>
    %2 = tpu.matmul %0, %1, %cst {dimension_numbers = #tpu.dot_dimension_numbers<[1], [0], [0], [1], [0, 0, 1, 1], [], []>} : vector<256x16xbf16>, vector<16x64xbf16>, vector<256x64xf32> -> vector<256x64xf32>
    %c0_3 = arith.constant 0 : index
    %c0_4 = arith.constant 0 : index
    %3 = vector.load %arg3[%c0_3, %c0_4] : memref<1x64xf32, #tpu.memory_space<vmem>>, vector<1x64xf32>
    %4 = vector.broadcast %3 : vector<1x64xf32> to vector<256x64xf32>
    %5 = arith.addf %2, %4 : vector<256x64xf32>
    %6 = math.tanh %5 : vector<256x64xf32>
    %7 = arith.truncf %6 : vector<256x64xf32> to vector<256x64xbf16>
    %c0_5 = arith.constant 0 : index
    %c0_6 = arith.constant 0 : index
    %8 = vector.load %arg4[%c0_5, %c0_6] : memref<64x64xbf16, #tpu.memory_space<vmem>>, vector<64x64xbf16>
    %cst_7 = arith.constant dense<0.000000e+00> : vector<256x64xf32>
    %9 = tpu.matmul %7, %8, %cst_7 {dimension_numbers = #tpu.dot_dimension_numbers<[1], [0], [0], [1], [0, 0, 1, 1], [], []>} : vector<256x64xbf16>, vector<64x64xbf16>, vector<256x64xf32> -> vector<256x64xf32>
    %c0_8 = arith.constant 0 : index
    %c0_9 = arith.constant 0 : index
    %10 = vector.load %arg5[%c0_8, %c0_9] : memref<1x64xf32, #tpu.memory_space<vmem>>, vector<1x64xf32>
    %11 = vector.broadcast %10 : vector<1x64xf32> to vector<256x64xf32>
    %12 = arith.addf %9, %11 : vector<256x64xf32>
    %13 = math.tanh %12 : vector<256x64xf32>
    %14 = arith.truncf %13 : vector<256x64xf32> to vector<256x64xbf16>
    %c0_10 = arith.constant 0 : index
    %c0_11 = arith.constant 0 : index
    %15 = vector.load %arg6[%c0_10, %c0_11] : memref<64x32xbf16, #tpu.memory_space<vmem>>, vector<64x32xbf16>
    %cst_12 = arith.constant dense<0.000000e+00> : vector<256x32xf32>
    %16 = tpu.matmul %14, %15, %cst_12 {dimension_numbers = #tpu.dot_dimension_numbers<[1], [0], [0], [1], [0, 0, 1, 1], [], []>} : vector<256x64xbf16>, vector<64x32xbf16>, vector<256x32xf32> -> vector<256x32xf32>
    %c0_13 = arith.constant 0 : index
    %c0_14 = arith.constant 0 : index
    %17 = vector.load %arg7[%c0_13, %c0_14] : memref<1x32xf32, #tpu.memory_space<vmem>>, vector<1x32xf32>
    %18 = vector.broadcast %17 : vector<1x32xf32> to vector<256x32xf32>
    %19 = arith.addf %16, %18 : vector<256x32xf32>
    %cst_15 = arith.constant 0.000000e+00 : f32
    %20 = vector.broadcast %cst_15 : f32 to vector<256x32xf32>
    %21 = arith.maximumf %19, %20 : vector<256x32xf32>
    %22 = math.absf %19 : vector<256x32xf32>
    %cst_16 = arith.constant -2.000000e+00 : f32
    %23 = vector.broadcast %cst_16 : f32 to vector<256x32xf32>
    %24 = arith.mulf %23, %22 : vector<256x32xf32>
    %25 = math.exp %24 : vector<256x32xf32>
    %26 = math.log1p %25 : vector<256x32xf32>
    %cst_17 = arith.constant 5.000000e-01 : f32
    %27 = vector.broadcast %cst_17 : f32 to vector<256x32xf32>
    %28 = arith.mulf %27, %26 : vector<256x32xf32>
    %29 = arith.addf %21, %28 : vector<256x32xf32>
    %cst_18 = arith.constant 0.000000e+00 : f32
    %30 = vector.broadcast %cst_18 : f32 to vector<256x32xf32>
    %31 = arith.subf %30, %29 : vector<256x32xf32>
    %c0_19 = arith.constant 0 : index
    %c0_20 = arith.constant 0 : index
    %32 = vector.load %arg8[%c0_19, %c0_20] : memref<256x32xf32, #tpu.memory_space<vmem>>, vector<256x32xf32>
    tpu.vector_store %arg8[%c0_19, %c0_20], %31 {strides = array<i32>} : memref<256x32xf32, #tpu.memory_space<vmem>>, vector<256x32xf32>,
    return
  }
  func.func @transform_0(%arg0: i32) -> (i32, i32) {
    %c0_i32 = arith.constant 0 : i32
    %c0_i32_0 = arith.constant 0 : i32
    return %arg0, %c0_i32 : i32, i32
  }
  func.func @transform_1(%arg0: i32) -> (i32, i32) {
    %c0_i32 = arith.constant 0 : i32
    %c0_i32_0 = arith.constant 0 : i32
    %c0_i32_1 = arith.constant 0 : i32
    return %c0_i32, %c0_i32_0 : i32, i32
  }
  func.func @transform_2(%arg0: i32) -> (i32, i32) {
    %c0_i32 = arith.constant 0 : i32
    %c0_i32_0 = arith.constant 0 : i32
    %c0_i32_1 = arith.constant 0 : i32
    return %c0_i32, %c0_i32_0 : i32, i32
  }
  func.func @transform_3(%arg0: i32) -> (i32, i32) {
    %c0_i32 = arith.constant 0 : i32
    %c0_i32_0 = arith.constant 0 : i32
    %c0_i32_1 = arith.constant 0 : i32
    return %c0_i32, %c0_i32_0 : i32, i32
  }
  func.func @transform_4(%arg0: i32) -> (i32, i32) {
    %c0_i32 = arith.constant 0 : i32
    %c0_i32_0 = arith.constant 0 : i32
    %c0_i32_1 = arith.constant 0 : i32
    return %c0_i32, %c0_i32_0 : i32, i32
  }
  func.func @transform_5(%arg0: i32) -> (i32, i32) {
    %c0_i32 = arith.constant 0 : i32
    %c0_i32_0 = arith.constant 0 : i32
    %c0_i32_1 = arith.constant 0 : i32
    return %c0_i32, %c0_i32_0 : i32, i32
  }
  func.func @transform_6(%arg0: i32) -> (i32, i32) {
    %c0_i32 = arith.constant 0 : i32
    %c0_i32_0 = arith.constant 0 : i32
    %c0_i32_1 = arith.constant 0 : i32
    return %c0_i32, %c0_i32_0 : i32, i32
  }
  func.func @transform_7(%arg0: i32) -> (i32, i32) {
    %c0_i32 = arith.constant 0 : i32
    %c0_i32_0 = arith.constant 0 : i32
    return %arg0, %c0_i32 : i32, i32
  }
}

</mosaic_0001>

<bundles_post_ra>
// kernel: tpu_custom_call.1
= control target key start
LH: loop header
LB: loop body
LE: loop exit
PB: predicated region body
PF: predicated region fallthrough
CT: control target
= control target key end

     0   :  { %s2130_s24 = smov 0   ;;  %s2542_s0 = inlined_call_operand.vmem [shape: bf16[512,16], index: 0, kind: input, shape index: {}]   ;;  %s2543_s1 = inlined_call_operand.vmem [shape: bf16[16,64], index: 1, kind: input, shape index: {}]   ;;  %s2544_s2 = inlined_call_operand.vmem [shape: f32[1,64], index: 2, kind: input, shape index: {}]   ;;  %s2545_s3 = inlined_call_operand.vmem [shape: bf16[64,64], index: 3, kind: input, shape index: {}]   ;;  %s2546_s4 = inlined_call_operand.vmem [shape: f32[1,64], index: 4, kind: input, shape index: {}]   ;;  %s2547_s5 = inlined_call_operand.vmem [shape: bf16[64,32], index: 5, kind: input, shape index: {}]   ;;  %s2548_s6 = inlined_call_operand.vmem [shape: f32[1,32], index: 6, kind: input, shape index: {}]   ;;  %s2549_s7 = inlined_call_operand.vmem [shape: f32[512,32], index: 7, kind: output, shape index: {}]  }
   0x1 LB: > { %s1621_s25 = sadd.s32 4294967295, %s2088_s24   ;;  %p1625_p0 = scmp.ge.s32.totalorder %s2088_s24, 1  ;;  %s2088_s24 = sphi %s2130_s24, %s17_s24  }
   0x2   : > { %p238_p1 = scmp.lt.s32.totalorder %s2088_s24, 3 }
   0x4   : > { %p239_p2 = pnand %p1625_p0, %p238_p1 }
   0x5   : > { %s1626_s28 = sshll.u32 (!%p239_p2), %s1621_s25, 5 }
   0x6   : > { %242 = sbr.rel (%p239_p2) target bundleno = 726 (0x2d6), region = 48  ;;  %p271_p3 = scmp.lt.s32.totalorder (!%p239_p2), %s1626_s28, 63 }
   0xb   : > { %v1796_v0 = vld [vmem:[%s2543_s1] sm:$0xff]  ;;  %s2551_s28 = smov (!%p271_p3, %s1626_s28), 63  ;;  %vm407_vm0 = vcmask 130048   ;;  %v1800_v8 = vld [vmem:[%s2545_s3 + $0x18] sm:$0xff]  ;;  %v1799_v9 = vld [vmem:[%s2545_s3 + $0x10] sm:$0xff]  ;;  %vm629_vm1 = vcmask 523264  }
   0xc   : > { %463 = vmatpush.bf16.msra.mxu0 %v1796_v0  ;;  %1805 = vmatpush.bf16.msra.mxu3 %v1796_v0  ;;  %s1627_s29 = sshll.u32 %s2551_s28, 2  ;;  %v1798_v10 = vld [vmem:[%s2545_s3 + $0x8] sm:$0xff]  ;;  %v1797_v12 = vld [vmem:[%s2545_s3] sm:$0xff]  ;;  %s1629_s11 = sshll.u32 %s2551_s28, 3  ;;  %vm1532_vm3 = vcmask 261120  }
   0xd   : > { %s2147_s9 = scalar_lea.vmem %s2542_s0, %s1627_s29  ;;  %682 = vmatpush.bf16.msra.mxu1 %v1800_v8  ;;  %v2181_v15 = vld [vmem:[%s2544_s2] ss:$0 sm:$0xff]  ;;  %s2318_s14 = scalar_lea.vmem %s2549_s7, %s1629_s11 }
   0xe   : > { %v1780_v1 = vld [vmem:[%s2147_s9] sm:$0xff]  ;;  %v1781_v2 = vld [vmem:[%s2147_s9 + $0x8] sm:$0xff]  ;;  %v1782_v3 = vld [vmem:[%s2147_s9 + $0x10] sm:$0xff] }
   0xf   : > { %1698 = vmatmul.msk.bf16.vlgmr.msra.gmra.mxu0 %vm407_vm0, %v1780_v1  ;;  %v1783_v4 = vld [vmem:[%s2147_s9 + $0x18] sm:$0xff]  ;;  %v1784_v5 = vld [vmem:[%s2147_s9 + $0x20] sm:$0xff]  ;;  %v1785_v6 = vld [vmem:[%s2147_s9 + $0x28] sm:$0xff] }
  0x10   : > { %v1786_v7 = vld [vmem:[%s2147_s9 + $0x30] sm:$0xff]  ;;  %1806 = vmatpush.bf16.msrb.mxu3 %v1800_v8  ;;  %v1787_v11 = vld [vmem:[%s2147_s9 + $0x38] sm:$0xff]  ;;  %v1788_v13 = vld [vmem:[%s2147_s9 + $0x40] sm:$0xff] }
  0x11   : > { %683 = vmatpush.bf16.msra.mxu1 %v1799_v9  ;;  %v1789_v19 = vld [vmem:[%s2147_s9 + $0x48] sm:$0xff]  ;;  %v1790_v27 = vld [vmem:[%s2147_s9 + $0x50] sm:$0xff]  ;;  %v1791_v36 = vld [vmem:[%s2147_s9 + $0x58] sm:$0xff] }
  0x12   : > { %v1793_v32 = vld [vmem:[%s2147_s9 + $0x68] sm:$0xff]  ;;  %v1794_v41 = vld [vmem:[%s2147_s9 + $0x70] sm:$0xff]  ;;  %v1792_v45 = vld [vmem:[%s2147_s9 + $0x60] sm:$0xff] }
  0x13   : > { %1711 = vmatmul.msk.bf16.vlgmr.msra.gmra.mxu3 %vm407_vm0, %v1793_v32  ;;  %v1795_v50 = vld [vmem:[%s2147_s9 + $0x78] sm:$0xff] }
  0x14   : > { %1807 = vmatpush.bf16.msrb.mxu3 %v1799_v9  ;;  %v1804_v8 = vld [vmem:[%s2547_s5 + $0x18] sm:$0xff] }
  0x15   : > { %684 = vmatpush.bf16.msra.mxu1 %v1798_v10  ;;  %903 = vmatpush.bf16.msra.mxu2 %v1804_v8 }
  0x18   : > { %1808 = vmatpush.bf16.msrb.mxu3 %v1798_v10 }
  0x19   : > { %685 = vmatpush.bf16.msra.mxu1 %v1797_v12 }
  0x1c   : > { %1809 = vmatpush.bf16.msrb.mxu3 %v1797_v12 }
  0x1f   : > { %1699 = vmatmul.msk.bf16.gmra.mxu0 %vm407_vm0, %v1781_v2 }
  0x20   : > { %1810 = vmatpush.bf16.msra.mxu3 %v1804_v8 }
  0x23   : > { %1712 = vmatmul.msk.bf16.gmra.mxu3 %vm407_vm0, %v1794_v41 }
  0x2f   : > { %1700 = vmatmul.msk.bf16.gmra.mxu0 %vm407_vm0, %v1782_v3 }
  0x33   : > { %1713 = vmatmul.msk.bf16.gmra.mxu3 %vm407_vm0, %v1795_v50 }
  0x3f   : > { %1701 = vmatmul.msk.bf16.gmra.mxu0 %vm407_vm0, %v1783_v4 }
  0x4f   : > { %1702 = vmatmul.msk.bf16.gmra.mxu0 %vm407_vm0, %v1784_v5 }
  0x5f   : > { %1703 = vmatmul.msk.bf16.gmra.mxu0 %vm407_vm0, %v1785_v6 }
  0x6f   : > { %1704 = vmatmul.msk.bf16.gmra.mxu0 %vm407_vm0, %v1786_v7 }
  0x7f   : > { %1705 = vmatmul.msk.bf16.gmra.mxu0 %vm407_vm0, %v1787_v11  ;;  %v1803_v11 = vld [vmem:[%s2547_s5 + $0x10] sm:$0xff] }
  0x80   : > { %904 = vmatpush.bf16.msra.mxu2 %v1803_v11  ;;  %1811 = vmatpush.bf16.msra.mxu3 %v1803_v11 }
  0x8c   : > { %v465_v14 = vpop.f32.mrf.mxu0 }
  0x8d   : > { %v466_v16 = vadd.f32 %v2181_v15, %v465_v14 }
  0x8f   : > { %1706 = vmatmul.msk.bf16.gmra.mxu0 %vm407_vm0, %v1788_v13  ;;  %1825 = vtanh.f32 %v466_v16  ;;  %v1802_v13 = vld [vmem:[%s2547_s5 + $0x8] sm:$0xff] }
  0x90   : > { %905 = vmatpush.bf16.msra.mxu2 %v1802_v13  ;;  %1812 = vmatpush.bf16.msra.mxu3 %v1802_v13 }
  0x94   : > { %v467_v17 = vpop.f32.mrf.mxu0 }
  0x95   : > { %v468_v18 = vadd.f32 %v2181_v15, %v467_v17  ;;  %v1826_v20 = vpop.eup %1825  ;;  %v1801_v17 = vld [vmem:[%s2547_s5] sm:$0xff] }
  0x96   : > { %906 = vmatpush.bf16.msra.mxu2 %v1801_v17  ;;  %1813 = vmatpush.bf16.msra.mxu3 %v1801_v17 }
  0x97   : > { %1827 = vtanh.f32 %v468_v18 }
  0x9c   : > { %v470_v21 = vpop.f32.mrf.mxu0 }
  0x9d   : > { %v1828_v22 = vpop.eup %1827  ;;  %v471_v24 = vadd.f32 %v2181_v15, %v470_v21 }
  0x9e   : > { %v577_v23 = vpack.c.bf16 %v1828_v22, %v1826_v20 }
  0x9f   : > { %1707 = vmatmul.msk.bf16.gmra.mxu0 %vm407_vm0, %v1789_v19  ;;  %1829 = vtanh.f32 %v471_v24 }
  0xa0   : > { %1730 = vmatmul.msk.bf16.vlgmr.msra.gmra.mxu1 %vm629_vm1, %v577_v23 }
  0xa4   : > { %v472_v25 = vpop.f32.mrf.mxu0 }
  0xa5   : > { %v473_v26 = vadd.f32 %v2181_v15, %v472_v25  ;;  %v1830_v28 = vpop.eup %1829 }
  0xa7   : > { %1831 = vtanh.f32 %v473_v26 }
  0xac   : > { %v475_v29 = vpop.f32.mrf.mxu0 }
  0xad   : > { %v1832_v30 = vpop.eup %1831  ;;  %v476_v33 = vadd.f32 %v2181_v15, %v475_v29 }
  0xae   : > { %v578_v31 = vpack.c.bf16 %v1832_v30, %v1830_v28 }
  0xaf   : > { %1708 = vmatmul.msk.bf16.gmra.mxu0 %vm407_vm0, %v1790_v27  ;;  %1833 = vtanh.f32 %v476_v33  ;;  %v2239_v27 = vld [vmem:[%s2546_s4] ss:$0 sm:$0xff] }
  0xb0   : > { %1731 = vmatmul.msk.bf16.gmra.mxu1 %vm629_vm1, %v578_v31 }
  0xb4   : > { %v477_v34 = vpop.f32.mrf.mxu0 }
  0xb5   : > { %v478_v35 = vadd.f32 %v2181_v15, %v477_v34  ;;  %v1834_v37 = vpop.eup %1833 }
  0xb7   : > { %1835 = vtanh.f32 %v478_v35 }
  0xbc   : > { %v480_v38 = vpop.f32.mrf.mxu0 }
  0xbd   : > { %v1836_v39 = vpop.eup %1835  ;;  %v481_v42 = vadd.f32 %v2181_v15, %v480_v38 }
  0xbe   : > { %v579_v40 = vpack.c.bf16 %v1836_v39, %v1834_v37 }
  0xbf   : > { %1709 = vmatmul.msk.bf16.gmra.mxu0 %vm407_vm0, %v1791_v36  ;;  %1837 = vtanh.f32 %v481_v42 }
  0xc0   : > { %1732 = vmatmul.msk.bf16.gmra.mxu1 %vm629_vm1, %v579_v40 }
  0xc4   : > { %v482_v43 = vpop.f32.mrf.mxu0 }
  0xc5   : > { %v483_v44 = vadd.f32 %v2181_v15, %v482_v43  ;;  %v1838_v46 = vpop.eup %1837 }
  0xc7   : > { %1839 = vtanh.f32 %v483_v44 }
  0xcc   : > { %v485_v47 = vpop.f32.mrf.mxu0 }
  0xcd   : > { %v1840_v48 = vpop.eup %1839  ;;  %v486_v51 = vadd.f32 %v2181_v15, %v485_v47 }
  0xce   : > { %v580_v49 = vpack.c.bf16 %v1840_v48, %v1838_v46 }
  0xcf   : > { %1710 = vmatmul.msk.bf16.gmra.mxu0 %vm407_vm0, %v1792_v45  ;;  %1841 = vtanh.f32 %v486_v51 }
  0xd0   : > { %1733 = vmatmul.msk.bf16.gmra.mxu1 %vm629_vm1, %v580_v49 }
  0xd4   : > { %v487_v52 = vpop.f32.mrf.mxu0 }
  0xd5   : > { %v488_v53 = vadd.f32 %v2181_v15, %v487_v52  ;;  %v1842_v54 = vpop.eup %1841 }
  0xd7   : > { %1843 = vtanh.f32 %v488_v53 }
  0xdc   : > { %v490_v55 = vpop.f32.mrf.mxu0 }
  0xdd   : > { %v1844_v56 = vpop.eup %1843  ;;  %v491_v58 = vadd.f32 %v2181_v15, %v490_v55 }
  0xde   : > { %v581_v57 = vpack.c.bf16 %v1844_v56, %v1842_v54 }
  0xdf   : > { %1845 = vtanh.f32 %v491_v58 }
  0xe0   : > { %1734 = vmatmul.msk.bf16.gmra.mxu1 %vm629_vm1, %v581_v57 }
  0xe4   : > { %v492_v59 = vpop.f32.mrf.mxu0 }
  0xe5   : > { %v493_v60 = vadd.f32 %v2181_v15, %v492_v59  ;;  %v1846_v61 = vpop.eup %1845 }
  0xe7   : > { %1847 = vtanh.f32 %v493_v60 }
  0xec   : > { %v495_v62 = vpop.f32.mrf.mxu0 }
  0xed   : > { %v1848_v63 = vpop.eup %1847  ;;  %v496_v1 = vadd.f32 %v2181_v15, %v495_v62 }
  0xee   : > { %v582_v0 = vpack.c.bf16 %v1848_v63, %v1846_v61 }
  0xef   : > { %1849 = vtanh.f32 %v496_v1 }
  0xf0   : > { %1735 = vmatmul.msk.bf16.gmra.mxu1 %vm629_vm1, %v582_v0 }
  0xf4   : > { %v497_v2 = vpop.f32.mrf.mxu0 }
  0xf5   : > { %v498_v3 = vadd.f32 %v2181_v15, %v497_v2  ;;  %v1850_v4 = vpop.eup %1849  ;;  %v530_v2 = vpop.f32.mrf.mxu3 }
  0xf7   : > { %1851 = vtanh.f32 %v498_v3 }
  0xfc   : > { %v500_v5 = vpop.f32.mrf.mxu0 }
  0xfd   : > { %v1852_v6 = vpop.eup %1851  ;;  %v501_v9 = vadd.f32 %v2181_v15, %v500_v5 }
  0xfe   : > { %v583_v7 = vpack.c.bf16 %v1852_v6, %v1850_v4 }
  0xff   : > { %1853 = vtanh.f32 %v501_v9 }
 0x100   : > { %1736 = vmatmul.msk.bf16.gmra.mxu1 %vm629_vm1, %v583_v7 }
 0x104   : > { %v502_v10 = vpop.f32.mrf.mxu0 }
 0x105   : > { %v503_v12 = vadd.f32 %v2181_v15, %v502_v10  ;;  %v1854_v14 = vpop.eup %1853 }
 0x107   : > { %1855 = vtanh.f32 %v503_v12 }
 0x10c   : > { %v505_v16 = vpop.f32.mrf.mxu0 }
 0x10d   : > { %v1856_v18 = vpop.eup %1855  ;;  %v506_v20 = vadd.f32 %v2181_v15, %v505_v16 }
 0x10e   : > { %v584_v19 = vpack.c.bf16 %v1856_v18, %v1854_v14  ;;  %v532_v14 = vpop.f32.mrf.mxu3 }
 0x10f   : > { %1857 = vtanh.f32 %v506_v20 }
 0x110   : > { %1737 = vmatmul.msk.bf16.gmra.mxu1 %vm629_vm1, %v584_v19 }
 0x114   : > { %v507_v21 = vpop.f32.mrf.mxu0 }
 0x115   : > { %v508_v22 = vadd.f32 %v2181_v15, %v507_v21  ;;  %v1858_v23 = vpop.eup %1857 }
 0x117   : > { %1859 = vtanh.f32 %v508_v22 }
 0x11c   : > { %v510_v24 = vpop.f32.mrf.mxu0 }
 0x11d   : > { %v1860_v25 = vpop.eup %1859  ;;  %v687_v26 = vpop.f32.mrf.mxu1  ;;  %v511_v29 = vadd.f32 %v2181_v15, %v510_v24 }
 0x11e   : > { %v585_v28 = vpack.c.bf16 %v1860_v25, %v1858_v23  ;;  %v688_v30 = vadd.f32 %v2239_v27, %v687_v26  ;;  %v531_v23 = vadd.f32 %v2181_v15, %v530_v2  ;;  %v535_v24 = vpop.f32.mrf.mxu3  ;;  %v533_v25 = vadd.f32 %v2181_v15, %v532_v14 }
 0x11f   : > { %1861 = vtanh.f32 %v511_v29 }
 0x120   : > { %1738 = vmatmul.msk.bf16.gmra.mxu1 %vm629_vm1, %v585_v28  ;;  %1863 = vtanh.f32 %v688_v30 }
 0x124   : > { %v512_v31 = vpop.f32.mrf.mxu0 }
 0x125   : > { %v513_v32 = vadd.f32 %v2181_v15, %v512_v31  ;;  %v689_v33 = vpop.f32.mrf.mxu1  ;;  %v1862_v35 = vpop.eup %1861 }
 0x126   : > { %v690_v34 = vadd.f32 %v2239_v27, %v689_v33  ;;  %v1864_v36 = vpop.eup %1863  ;;  %v537_v31 = vpop.f32.mrf.mxu3 }
 0x127   : > { %1865 = vtanh.f32 %v513_v32 }
 0x128   : > { %1867 = vtanh.f32 %v690_v34 }
 0x12c   : > { %v515_v37 = vpop.f32.mrf.mxu0 }
 0x12d   : > { %v1866_v38 = vpop.eup %1865  ;;  %v692_v39 = vpop.f32.mrf.mxu1  ;;  %v516_v43 = vadd.f32 %v2181_v15, %v515_v37 }
 0x12e   : > { %v1868_v40 = vpop.eup %1867  ;;  %v586_v41 = vpack.c.bf16 %v1866_v38, %v1862_v35  ;;  %v693_v44 = vadd.f32 %v2239_v27, %v692_v39  ;;  %v536_v38 = vadd.f32 %v2181_v15, %v535_v24  ;;  %v538_v39 = vadd.f32 %v2181_v15, %v537_v31 }
 0x12f   : > { %v799_v42 = vpack.c.bf16 %v1868_v40, %v1864_v36  ;;  %1869 = vtanh.f32 %v516_v43 }
 0x130   : > { %1739 = vmatmul.msk.bf16.gmra.mxu1 %vm629_vm1, %v586_v41  ;;  %1871 = vtanh.f32 %v693_v44  ;;  %v540_v41 = vpop.f32.mrf.mxu3 }
 0x131   : > { %1762 = vmatmul.msk.bf16.vlgmr.msra.gmra.mxu2 %vm629_vm1, %v799_v42 }
 0x134   : > { %v517_v45 = vpop.f32.mrf.mxu0 }
 0x135   : > { %v518_v46 = vadd.f32 %v2181_v15, %v517_v45  ;;  %v694_v47 = vpop.f32.mrf.mxu1  ;;  %v1870_v49 = vpop.eup %1869 }
 0x136   : > { %v695_v48 = vadd.f32 %v2239_v27, %v694_v47  ;;  %v1872_v50 = vpop.eup %1871 }
 0x137   : > { %1873 = vtanh.f32 %v518_v46 }
 0x138   : > { %1875 = vtanh.f32 %v695_v48 }
 0x13c   : > { %v520_v51 = vpop.f32.mrf.mxu0 }
 0x13d   : > { %v1874_v52 = vpop.eup %1873  ;;  %v697_v53 = vpop.f32.mrf.mxu1  ;;  %v521_v57 = vadd.f32 %v2181_v15, %v520_v51 }
 0x13e   : > { %v1876_v54 = vpop.eup %1875  ;;  %v587_v55 = vpack.c.bf16 %v1874_v52, %v1870_v49  ;;  %v698_v58 = vadd.f32 %v2239_v27, %v697_v53  ;;  %v542_v49 = vpop.f32.mrf.mxu3  ;;  %v541_v52 = vadd.f32 %v2181_v15, %v540_v41 }
 0x13f   : > { %v800_v56 = vpack.c.bf16 %v1876_v54, %v1872_v50  ;;  %1877 = vtanh.f32 %v521_v57  ;;  %v543_v53 = vadd.f32 %v2181_v15, %v542_v49 }
 0x140   : > { %1740 = vmatmul.msk.bf16.gmra.mxu1 %vm629_vm1, %v587_v55  ;;  %1879 = vtanh.f32 %v698_v58 }
 0x141   : > { %1763 = vmatmul.msk.bf16.gmra.mxu2 %vm629_vm1, %v800_v56 }
 0x144   : > { %v522_v59 = vpop.f32.mrf.mxu0 }
 0x145   : > { %v523_v60 = vadd.f32 %v2181_v15, %v522_v59  ;;  %v699_v61 = vpop.f32.mrf.mxu1  ;;  %v1878_v63 = vpop.eup %1877 }
 0x146   : > { %v700_v62 = vadd.f32 %v2239_v27, %v699_v61  ;;  %v1880_v0 = vpop.eup %1879 }
 0x147   : > { %1881 = vtanh.f32 %v523_v60 }
 0x148   : > { %1883 = vtanh.f32 %v700_v62 }
 0x14c   : > { %v525_v1 = vpop.f32.mrf.mxu0 }
 0x14d   : > { %v1882_v3 = vpop.eup %1881  ;;  %v702_v4 = vpop.f32.mrf.mxu1  ;;  %v526_v8 = vadd.f32 %v2181_v15, %v525_v1 }
 0x14e   : > { %v1884_v5 = vpop.eup %1883  ;;  %v588_v6 = vpack.c.bf16 %v1882_v3, %v1878_v63  ;;  %v703_v9 = vadd.f32 %v2239_v27, %v702_v4 }
 0x14f   : > { %v801_v7 = vpack.c.bf16 %v1884_v5, %v1880_v0  ;;  %1885 = vtanh.f32 %v526_v8 }
 0x150   : > { %1741 = vmatmul.msk.bf16.gmra.mxu1 %vm629_vm1, %v588_v6  ;;  %1887 = vtanh.f32 %v703_v9 }
 0x151   : > { %1764 = vmatmul.msk.bf16.gmra.mxu2 %vm629_vm1, %v801_v7 }
 0x154   : > { %v527_v10 = vpop.f32.mrf.mxu0 }
 0x155   : > { %v528_v11 = vadd.f32 %v2181_v15, %v527_v10  ;;  %v704_v12 = vpop.f32.mrf.mxu1  ;;  %v1886_v16 = vpop.eup %1885 }
 0x156   : > { %v705_v13 = vadd.f32 %v2239_v27, %v704_v12  ;;  %v1888_v17 = vpop.eup %1887 }
 0x157   : > { %1889 = vtanh.f32 %v528_v11 }
 0x158   : > { %1891 = vtanh.f32 %v705_v13  ;;  %v2293_v13 = vld [vmem:[%s2548_s6] ss:$0 sm:$0xff] }
 0x159   : > { %1893 = vtanh.f32 %v531_v23 }
 0x15a   : > { %1895 = vtanh.f32 %v533_v25 }
 0x15d   : > { %v1890_v18 = vpop.eup %1889  ;;  %v707_v19 = vpop.f32.mrf.mxu1 }
 0x15e   : > { %v1892_v20 = vpop.eup %1891  ;;  %v589_v21 = vpack.c.bf16 %v1890_v18, %v1886_v16  ;;  %v708_v26 = vadd.f32 %v2239_v27, %v707_v19 }
 0x15f   : > { %v802_v22 = vpack.c.bf16 %v1892_v20, %v1888_v17  ;;  %v1894_v30 = vpop.eup %1893 }
 0x160   : > { %1742 = vmatmul.msk.bf16.vlgmr.msrb.gmra.mxu3 %vm629_vm1, %v589_v21  ;;  %1897 = vtanh.f32 %v708_v26  ;;  %v1896_v32 = vpop.eup %1895 }
 0x161   : > { %1765 = vmatmul.msk.bf16.gmra.mxu2 %vm629_vm1, %v802_v22  ;;  %v590_v36 = vpack.c.bf16 %v1896_v32, %v1894_v30 }
 0x165   : > { %v709_v28 = vpop.f32.mrf.mxu1 }
 0x166   : > { %v710_v29 = vadd.f32 %v2239_v27, %v709_v28  ;;  %v1898_v33 = vpop.eup %1897 }
 0x168   : > { %1899 = vtanh.f32 %v710_v29 }
 0x169   : > { %1901 = vtanh.f32 %v536_v38 }
 0x16a   : > { %1903 = vtanh.f32 %v538_v39 }
 0x16d   : > { %v712_v34 = vpop.f32.mrf.mxu1 }
 0x16e   : > { %v1900_v35 = vpop.eup %1899  ;;  %v713_v40 = vadd.f32 %v2239_v27, %v712_v34 }
 0x16f   : > { %v803_v37 = vpack.c.bf16 %v1900_v35, %v1898_v33  ;;  %v1902_v44 = vpop.eup %1901 }
 0x170   : > { %1743 = vmatmul.msk.bf16.gmra.mxu3 %vm629_vm1, %v590_v36  ;;  %1905 = vtanh.f32 %v713_v40  ;;  %v1904_v45 = vpop.eup %1903 }
 0x171   : > { %1766 = vmatmul.msk.bf16.gmra.mxu2 %vm629_vm1, %v803_v37  ;;  %v591_v50 = vpack.c.bf16 %v1904_v45, %v1902_v44 }
 0x175   : > { %v714_v42 = vpop.f32.mrf.mxu1 }
 0x176   : > { %v715_v43 = vadd.f32 %v2239_v27, %v714_v42  ;;  %v1906_v46 = vpop.eup %1905 }
 0x178   : > { %1907 = vtanh.f32 %v715_v43 }
 0x179   : > { %1909 = vtanh.f32 %v541_v52 }
 0x17a   : > { %1911 = vtanh.f32 %v543_v53 }
 0x17d   : > { %v717_v47 = vpop.f32.mrf.mxu1 }
 0x17e   : > { %v1908_v48 = vpop.eup %1907  ;;  %v718_v54 = vadd.f32 %v2239_v27, %v717_v47 }
 0x17f   : > { %v804_v51 = vpack.c.bf16 %v1908_v48, %v1906_v46  ;;  %v1910_v57 = vpop.eup %1909 }
 0x180   : > { %1744 = vmatmul.msk.bf16.gmra.mxu3 %vm629_vm1, %v591_v50  ;;  %1913 = vtanh.f32 %v718_v54  ;;  %v1912_v58 = vpop.eup %1911 }
 0x181   : > { %1767 = vmatmul.msk.bf16.gmra.mxu2 %vm629_vm1, %v804_v51  ;;  %v592_v62 = vpack.c.bf16 %v1912_v58, %v1910_v57 }
 0x185   : > { %v719_v55 = vpop.f32.mrf.mxu1 }
 0x186   : > { %v720_v56 = vadd.f32 %v2239_v27, %v719_v55  ;;  %v1914_v59 = vpop.eup %1913 }
 0x188   : > { %1915 = vtanh.f32 %v720_v56 }
 0x18d   : > { %v722_v60 = vpop.f32.mrf.mxu1 }
 0x18e   : > { %v1916_v61 = vpop.eup %1915  ;;  %v723_v15 = vadd.f32 %v2239_v27, %v722_v60 }
 0x18f   : > { %v805_v63 = vpack.c.bf16 %v1916_v61, %v1914_v59 }
 0x190   : > { %1745 = vmatmul.msk.bf16.gmra.mxu3 %vm629_vm1, %v592_v62  ;;  %1917 = vtanh.f32 %v723_v15 }
 0x191   : > { %1768 = vmatmul.msk.bf16.gmra.mxu2 %vm629_vm1, %v805_v63 }
 0x195   : > { %v724_v0 = vpop.f32.mrf.mxu1 }
 0x196   : > { %v725_v1 = vadd.f32 %v2239_v27, %v724_v0  ;;  %v1918_v2 = vpop.eup %1917 }
 0x198   : > { %1919 = vtanh.f32 %v725_v1 }
 0x19d   : > { %v727_v3 = vpop.f32.mrf.mxu1 }
 0x19e   : > { %v1920_v4 = vpop.eup %1919  ;;  %v728_v6 = vadd.f32 %v2239_v27, %v727_v3 }
 0x19f   : > { %v806_v5 = vpack.c.bf16 %v1920_v4, %v1918_v2 }
 0x1a0   : > { %1921 = vtanh.f32 %v728_v6 }
 0x1a1   : > { %1769 = vmatmul.msk.bf16.gmra.mxu2 %vm629_vm1, %v806_v5 }
 0x1a5   : > { %v729_v7 = vpop.f32.mrf.mxu1 }
 0x1a6   : > { %v730_v8 = vadd.f32 %v2239_v27, %v729_v7  ;;  %v1922_v9 = vpop.eup %1921 }
 0x1a8   : > { %1923 = vtanh.f32 %v730_v8 }
 0x1ad   : > { %v732_v10 = vpop.f32.mrf.mxu1 }
 0x1ae   : > { %v1924_v11 = vpop.eup %1923  ;;  %v733_v14 = vadd.f32 %v2239_v27, %v732_v10 }
 0x1af   : > { %v807_v12 = vpack.c.bf16 %v1924_v11, %v1922_v9 }
 0x1b0   : > { %1925 = vtanh.f32 %v733_v14 }
 0x1b1   : > { %1770 = vmatmul.msk.bf16.gmra.mxu2 %vm629_vm1, %v807_v12 }
 0x1b4   : > { %v908_v16 = vpop.f32.mrf.mxu2 }
 0x1b5   : > { %v909_v17 = vadd.f32 %v2293_v13, %v908_v16  ;;  %v734_v18 = vpop.f32.mrf.mxu1 }
 0x1b6   : > { %v735_v19 = vadd.f32 %v2239_v27, %v734_v18  ;;  %v1926_v24 = vpop.eup %1925 }
 0x1b7   : > { %v1020_v20 = vand.u32 2147483647, %v909_v17  ;;  %v988_v60 = vmax.f32 %v909_v17, 0.0 }
 0x1b8   : > { %1927 = vtanh.f32 %v735_v19 }
 0x1b9   : > { %v1052_v21 = vmul.f32 -2.0, %v1020_v20 }
 0x1bb   : > { %v1084_v22 = vmul.f32 1.442695, %v1052_v21 }
 0x1bc   : > { %v910_v23 = vpop.f32.mrf.mxu2 }
 0x1bd   : > { %1929 = vpow2.f32 %v1084_v22  ;;  %v2299_v25 = vadd.f32 %v2293_v13, %v910_v23  ;;  %v737_v26 = vpop.f32.mrf.mxu1 }
 0x1be   : > { %v1928_v28 = vpop.eup %1927  ;;  %v738_v34 = vadd.f32 %v2239_v27, %v737_v26 }
 0x1bf   : > { %v1021_v29 = vand.u32 2147483647, %v2299_v25  ;;  %v808_v30 = vpack.c.bf16 %v1928_v28, %v1926_v24  ;;  %v989_v18 = vmax.f32 %v2299_v25, 0.0 }
 0x1c1   : > { %v1053_v31 = vmul.f32 -2.0, %v1021_v29  ;;  %1771 = vmatmul.msk.bf16.gmra.mxu2 %vm629_vm1, %v808_v30 }
 0x1c3   : > { %v1930_v32 = vpop.eup %1929  ;;  %v1086_v33 = vmul.f32 1.442695, %v1053_v31 }
 0x1c4   : > { %v1148_v35 = vadd.f32 1.0, %v1930_v32  ;;  %v1151_v36 = vmul.f32 -0.5, %v1930_v32  ;;  %v913_v37 = vpop.f32.mrf.mxu2  ;;  %v1154_v44 = vand.u32 2147483647, %v1930_v32 }
 0x1c5   : > { %1931 = vpow2.f32 %v1086_v33  ;;  %v2305_v38 = vadd.f32 %v2293_v13, %v913_v37  ;;  %v739_v39 = vpop.f32.mrf.mxu1 }
 0x1c6   : > { %1933 = vlog2.f32 %v1148_v35  ;;  %v740_v40 = vadd.f32 %v2239_v27, %v739_v39  ;;  %v1152_v42 = vadd.f32 1.0, %v1151_v36  ;;  %vm1155_vm2 = vcmp.lt.f32.partialorder %v1154_v44, 0.0004427343 }
 0x1c7   : > { %1935 = vtanh.f32 %v738_v34  ;;  %v1022_v41 = vand.u32 2147483647, %v2305_v38 }
 0x1c8   : > { %1937 = vtanh.f32 %v740_v40  ;;  %v1153_v48 = vmul.f32 %v1930_v32, %v1152_v42 }
 0x1c9   : > { %v1054_v43 = vmul.f32 -2.0, %v1022_v41  ;;  %v990_v41 = vmax.f32 %v2305_v38, 0.0 }
 0x1cb   : > { %v1932_v45 = vpop.eup %1931  ;;  %v1088_v46 = vmul.f32 1.442695, %v1054_v43 }
 0x1cc   : > { %v1934_v47 = vpop.eup %1933  ;;  %v1157_v49 = vadd.f32 1.0, %v1932_v45  ;;  %v915_v50 = vpop.f32.mrf.mxu2  ;;  %v1160_v53 = vmul.f32 -0.5, %v1932_v45  ;;  %v1163_v0 = vand.u32 2147483647, %v1932_v45 }
 0x1cd   : > { %v1936_v51 = vpop.eup %1935  ;;  %v1150_v52 = vmul.f32 0.6931472, %v1934_v47  ;;  %1939 = vpow2.f32 %v1088_v46  ;;  %v2310_v54 = vadd.f32 %v2293_v13, %v915_v50  ;;  %v742_v55 = vpop.f32.mrf.mxu1 }
 0x1ce   : > { %v1938_v56 = vpop.eup %1937  ;;  %1941 = vlog2.f32 %v1157_v49  ;;  %v1161_v62 = vadd.f32 1.0, %v1160_v53  ;;  %v743_v3 = vadd.f32 %v2239_v27, %v742_v55  ;;  %vm1164_vm4 = vcmp.lt.f32.partialorder %v1163_v0, 0.0004427343 }
 0x1cf   : > { %v1156_v57 = vsel %vm1155_vm2, %v1153_v48, %v1150_v52  ;;  %v1023_v58 = vand.u32 2147483647, %v2310_v54  ;;  %v809_v59 = vpack.c.bf16 %v1938_v56, %v1936_v51 }
 0x1d0   : > { %v1436_v61 = vmul.f32 0.5, %v1156_v57  ;;  %v1162_v10 = vmul.f32 %v1932_v45, %v1161_v62 }
 0x1d1   : > { %v1055_v63 = vmul.f32 -2.0, %v1023_v58  ;;  %1772 = vmatmul.msk.bf16.gmra.mxu2 %vm629_vm1, %v809_v59 }
 0x1d2   : > { %v1468_v15 = vadd.f32 %v1436_v61, %v988_v60  ;;  %v991_v61 = vmax.f32 %v2310_v54, 0.0 }
 0x1d3   : > { %v1940_v1 = vpop.eup %1939  ;;  %v1090_v2 = vmul.f32 1.442695, %v1055_v63 }
 0x1d4   : > { %v1942_v4 = vpop.eup %1941  ;;  %v1500_v5 = vsub.f32 0.0, %v1468_v15  ;;  %v1166_v6 = vadd.f32 1.0, %v1940_v1  ;;  %v1169_v7 = vmul.f32 -0.5, %v1940_v1  ;;  %v918_v8 = vpop.f32.mrf.mxu2  ;;  %v1172_v23 = vand.u32 2147483647, %v1940_v1 }
 0x1d5   : > { %v1159_v9 = vmul.f32 0.6931472, %v1942_v4  ;;  %1943 = vpow2.f32 %v1090_v2  ;;  %v2322_v11 = vadd.f32 %v2293_v13, %v918_v8  ;;  %v744_v12 = vpop.f32.mrf.mxu1 }
 0x1d6   : > { %1533 = vst.msk [vmem:[%s2318_s14] sm:$0xff] %vm1532_vm3, %v1500_v5  ;;  %1945 = vlog2.f32 %v1166_v6  ;;  %v745_v14 = vadd.f32 %v2239_v27, %v744_v12  ;;  %v1170_v20 = vadd.f32 1.0, %v1169_v7  ;;  %vm1173_vm5 = vcmp.lt.f32.partialorder %v1172_v23, 0.0004427343 }
 0x1d7   : > { %v1165_v16 = vsel %vm1164_vm4, %v1162_v10, %v1159_v9  ;;  %1947 = vtanh.f32 %v743_v3  ;;  %v1024_v17 = vand.u32 2147483647, %v2322_v11 }
 0x1d8   : > { %v1437_v19 = vmul.f32 0.5, %v1165_v16  ;;  %1949 = vtanh.f32 %v745_v14  ;;  %v1171_v30 = vmul.f32 %v1940_v1, %v1170_v20 }
 0x1d9   : > { %v1056_v21 = vmul.f32 -2.0, %v1024_v17 }
 0x1da   : > { %v1469_v22 = vadd.f32 %v1437_v19, %v989_v18  ;;  %v992_v18 = vmax.f32 %v2322_v11, 0.0 }
 0x1db   : > { %v1944_v24 = vpop.eup %1943  ;;  %v1092_v26 = vmul.f32 1.442695, %v1056_v21 }
 0x1dc   : > { %v1946_v28 = vpop.eup %1945  ;;  %v1501_v29 = vsub.f32 0.0, %v1469_v22  ;;  %v1175_v31 = vadd.f32 1.0, %v1944_v24  ;;  %v920_v32 = vpop.f32.mrf.mxu2  ;;  %v1178_v35 = vmul.f32 -0.5, %v1944_v24  ;;  %v1181_v46 = vand.u32 2147483647, %v1944_v24 }
 0x1dd   : > { %v1948_v33 = vpop.eup %1947  ;;  %v1168_v34 = vmul.f32 0.6931472, %v1946_v28  ;;  %1951 = vpow2.f32 %v1092_v26  ;;  %v2330_v25 = vadd.f32 %v2293_v13, %v920_v32 }
 0x1de   : > { %v1950_v36 = vpop.eup %1949  ;;  %1534 = vst.msk [vmem:[%s2318_s14 + $0x8] sm:$0xff] %vm1532_vm3, %v1501_v29  ;;  %1953 = vlog2.f32 %v1175_v31  ;;  %v1179_v43 = vadd.f32 1.0, %v1178_v35  ;;  %vm1182_vm6 = vcmp.lt.f32.partialorder %v1181_v46, 0.0004427343 }
 0x1df   : > { %v1174_v37 = vsel %vm1173_vm5, %v1171_v30, %v1168_v34  ;;  %v1025_v39 = vand.u32 2147483647, %v2330_v25  ;;  %v810_v40 = vpack.c.bf16 %v1950_v36, %v1948_v33 }
 0x1e0   : > { %v1438_v42 = vmul.f32 0.5, %v1174_v37  ;;  %v1180_v57 = vmul.f32 %v1944_v24, %v1179_v43  ;;  %v993_v43 = vmax.f32 %v2330_v25, 0.0 }
 0x1e1   : > { %v1057_v44 = vmul.f32 -2.0, %v1025_v39  ;;  %1773 = vmatmul.msk.bf16.gmra.mxu2 %vm629_vm1, %v810_v40 }
 0x1e2   : > { %v1470_v45 = vadd.f32 %v1438_v42, %v990_v41 }
 0x1e3   : > { %v1952_v47 = vpop.eup %1951  ;;  %v1094_v48 = vmul.f32 1.442695, %v1057_v44  ;;  %v747_v49 = vpop.f32.mrf.mxu3 }
 0x1e4   : > { %v1954_v50 = vpop.eup %1953  ;;  %v1502_v51 = vsub.f32 0.0, %v1470_v45  ;;  %v1184_v52 = vadd.f32 1.0, %v1952_v47  ;;  %v1187_v53 = vmul.f32 -0.5, %v1952_v47  ;;  %v923_v55 = vpop.f32.mrf.mxu2  ;;  %v748_v59 = vadd.f32 %v2239_v27, %v747_v49 }
 0x1e5   : > { %v1177_v56 = vmul.f32 0.6931472, %v1954_v50  ;;  %1955 = vpow2.f32 %v1094_v48  ;;  %v2338_v38 = vadd.f32 %v2293_v13, %v923_v55  ;;  %v1190_v1 = vand.u32 2147483647, %v1952_v47 }
 0x1e6   : > { %1535 = vst.msk [vmem:[%s2318_s14 + $0x10] sm:$0xff] %vm1532_vm3, %v1502_v51  ;;  %1957 = vlog2.f32 %v1184_v52  ;;  %v1188_v63 = vadd.f32 1.0, %v1187_v53 }
 0x1e7   : > { %v1183_v58 = vsel %vm1182_vm6, %v1180_v57, %v1177_v56  ;;  %v1026_v60 = vand.u32 2147483647, %v2338_v38  ;;  %1959 = vtanh.f32 %v748_v59  ;;  %vm1191_vm7 = vcmp.lt.f32.partialorder %v1190_v1, 0.0004427343 }
 0x1e8   : > { %v1439_v62 = vmul.f32 0.5, %v1183_v58  ;;  %v1189_v7 = vmul.f32 %v1952_v47, %v1188_v63  ;;  %v994_v63 = vmax.f32 %v2338_v38, 0.0 }
 0x1e9   : > { %v1058_v15 = vmul.f32 -2.0, %v1026_v60 }
 0x1ea   : > { %v1471_v0 = vadd.f32 %v1439_v62, %v991_v61 }
 0x1eb   : > { %v1956_v2 = vpop.eup %1955  ;;  %v1096_v3 = vmul.f32 1.442695, %v1058_v15  ;;  %v749_v4 = vpop.f32.mrf.mxu3 }
 0x1ec   : > { %v1958_v5 = vpop.eup %1957  ;;  %v1503_v6 = vsub.f32 0.0, %v1471_v0  ;;  %v1193_v8 = vadd.f32 1.0, %v1956_v2  ;;  %v1196_v9 = vmul.f32 -0.5, %v1956_v2  ;;  %v925_v10 = vpop.f32.mrf.mxu2  ;;  %v750_v54 = vadd.f32 %v2239_v27, %v749_v4 }
 0x1ed   : > { %v1186_v12 = vmul.f32 0.6931472, %v1958_v5  ;;  %1961 = vpow2.f32 %v1096_v3  ;;  %v2347_v14 = vadd.f32 %v2293_v13, %v925_v10  ;;  %v1960_v20 = vpop.eup %1959  ;;  %v1199_v24 = vand.u32 2147483647, %v1956_v2 }
 0x1ee   : > { %1536 = vst.msk [vmem:[%s2318_s14 + $0x18] sm:$0xff] %vm1532_vm3, %v1503_v6  ;;  %1963 = vlog2.f32 %v1193_v8  ;;  %v1197_v21 = vadd.f32 1.0, %v1196_v9 }
 0x1ef   : > { %v1192_v16 = vsel %vm1191_vm7, %v1189_v7, %v1186_v12  ;;  %1965 = vtanh.f32 %v750_v54  ;;  %v1027_v17 = vand.u32 2147483647, %v2347_v14  ;;  %vm1200_vm8 = vcmp.lt.f32.partialorder %v1199_v24, 0.0004427343 }
 0x1f0   : > { %v1440_v19 = vmul.f32 0.5, %v1192_v16  ;;  %v1198_v37 = vmul.f32 %v1956_v2, %v1197_v21 }
 0x1f1   : > { %v1059_v22 = vmul.f32 -2.0, %v1027_v17 }
 0x1f2   : > { %v1472_v23 = vadd.f32 %v1440_v19, %v992_v18 }
 0x1f3   : > { %v1962_v26 = vpop.eup %1961  ;;  %v1098_v28 = vmul.f32 1.442695, %v1059_v22  ;;  %v752_v29 = vpop.f32.mrf.mxu3 }
 0x1f4   : > { %v1964_v30 = vpop.eup %1963  ;;  %v1504_v31 = vsub.f32 0.0, %v1472_v23  ;;  %v1202_v32 = vadd.f32 1.0, %v1962_v26  ;;  %v1205_v33 = vmul.f32 -0.5, %v1962_v26  ;;  %v928_v34 = vpop.f32.mrf.mxu2  ;;  %v753_v41 = vadd.f32 %v2239_v27, %v752_v29 }
 0x1f5   : > { %v1966_v35 = vpop.eup %1965  ;;  %v1195_v36 = vmul.f32 0.6931472, %v1964_v30  ;;  %1967 = vpow2.f32 %v1098_v28  ;;  %v2354_v11 = vadd.f32 %v2293_v13, %v928_v34  ;;  %v1208_v48 = vand.u32 2147483647, %v1962_v26 }
 0x1f6   : > { %1537 = vst.msk [vmem:[%s2318_s14 + $0x20] sm:$0xff] %vm1532_vm3, %v1504_v31  ;;  %1969 = vlog2.f32 %v1202_v32  ;;  %v811_v39 = vpack.c.bf16 %v1966_v35, %v1960_v20  ;;  %v1206_v45 = vadd.f32 1.0, %v1205_v33  ;;  %v995_v23 = vmax.f32 %v2347_v14, 0.0 }
 0x1f7   : > { %v1201_v40 = vsel %vm1200_vm8, %v1198_v37, %v1195_v36  ;;  %v1028_v42 = vand.u32 2147483647, %v2354_v11  ;;  %1971 = vtanh.f32 %v753_v41  ;;  %vm1209_vm9 = vcmp.lt.f32.partialorder %v1208_v48, 0.0004427343 }
 0x1f8   : > { %v1441_v44 = vmul.f32 0.5, %v1201_v40  ;;  %1774 = vmatmul.msk.bf16.vlgmr.msra.gmra.mxu3 %vm629_vm1, %v811_v39  ;;  %v1207_v55 = vmul.f32 %v1962_v26, %v1206_v45  ;;  %v996_v45 = vmax.f32 %v2354_v11, 0.0 }
 0x1f9   : > { %v1060_v46 = vmul.f32 -2.0, %v1028_v42 }
 0x1fa   : > { %v1473_v47 = vadd.f32 %v1441_v44, %v993_v43 }
 0x1fb   : > { %v1968_v49 = vpop.eup %1967  ;;  %v1100_v50 = vmul.f32 1.442695, %v1060_v46  ;;  %v754_v51 = vpop.f32.mrf.mxu3 }
 0x1fc   : > { %v1970_v52 = vpop.eup %1969  ;;  %v1505_v53 = vsub.f32 0.0, %v1473_v47  ;;  %v1211_v56 = vadd.f32 1.0, %v1968_v49  ;;  %v1214_v57 = vmul.f32 -0.5, %v1968_v49  ;;  %v930_v58 = vpop.f32.mrf.mxu2  ;;  %v755_v25 = vadd.f32 %v2239_v27, %v754_v51 }
 0x1fd   : > { %v1204_v59 = vmul.f32 0.6931472, %v1970_v52  ;;  %1973 = vpow2.f32 %v1100_v50  ;;  %v2364_v60 = vadd.f32 %v2293_v13, %v930_v58  ;;  %v1972_v0 = vpop.eup %1971  ;;  %v1217_v4 = vand.u32 2147483647, %v1968_v49 }
 0x1fe   : > { %1538 = vst.msk [vmem:[%s2318_s14 + $0x28] sm:$0xff] %vm1532_vm3, %v1505_v53  ;;  %1975 = vlog2.f32 %v1211_v56  ;;  %v1215_v1 = vadd.f32 1.0, %v1214_v57 }
 0x1ff   : > { %v1210_v61 = vsel %vm1209_vm9, %v1207_v55, %v1204_v59  ;;  %1977 = vtanh.f32 %v755_v25  ;;  %v1029_v62 = vand.u32 2147483647, %v2364_v60  ;;  %vm1218_vm10 = vcmp.lt.f32.partialorder %v1217_v4, 0.0004427343 }
 0x200   : > { %v1442_v15 = vmul.f32 0.5, %v1210_v61  ;;  %v1216_v18 = vmul.f32 %v1968_v49, %v1215_v1 }
 0x201   : > { %v1061_v2 = vmul.f32 -2.0, %v1029_v62 }
 0x202   : > { %v1474_v3 = vadd.f32 %v1442_v15, %v994_v63 }
 0x203   : > { %v1974_v5 = vpop.eup %1973  ;;  %v1102_v6 = vmul.f32 1.442695, %v1061_v2  ;;  %v757_v7 = vpop.f32.mrf.mxu3 }
 0x204   : > { %v1976_v8 = vpop.eup %1975  ;;  %v1506_v9 = vsub.f32 0.0, %v1474_v3  ;;  %v1220_v10 = vadd.f32 1.0, %v1974_v5  ;;  %v1223_v12 = vmul.f32 -0.5, %v1974_v5  ;;  %v933_v54 = vpop.f32.mrf.mxu2  ;;  %v758_v21 = vadd.f32 %v2239_v27, %v757_v7 }
 0x205   : > { %v1978_v16 = vpop.eup %1977  ;;  %v1213_v17 = vmul.f32 0.6931472, %v1976_v8  ;;  %1979 = vpow2.f32 %v1102_v6  ;;  %v2371_v38 = vadd.f32 %v2293_v13, %v933_v54  ;;  %v1226_v30 = vand.u32 2147483647, %v1974_v5 }
 0x206   : > { %1539 = vst.msk [vmem:[%s2318_s14 + $0x30] sm:$0xff] %vm1532_vm3, %v1506_v9  ;;  %1981 = vlog2.f32 %v1220_v10  ;;  %v812_v19 = vpack.c.bf16 %v1978_v16, %v1972_v0  ;;  %v1224_v26 = vadd.f32 1.0, %v1223_v12  ;;  %v997_v3 = vmax.f32 %v2364_v60, 0.0 }
 0x207   : > { %v1219_v20 = vsel %vm1218_vm10, %v1216_v18, %v1213_v17  ;;  %v1030_v22 = vand.u32 2147483647, %v2371_v38  ;;  %1983 = vtanh.f32 %v758_v21  ;;  %vm1227_vm11 = vcmp.lt.f32.partialorder %v1226_v30, 0.0004427343 }
 0x208   : > { %v1443_v24 = vmul.f32 0.5, %v1219_v20  ;;  %1775 = vmatmul.msk.bf16.gmra.mxu3 %vm629_vm1, %v812_v19  ;;  %v1225_v36 = vmul.f32 %v1974_v5, %v1224_v26  ;;  %v998_v26 = vmax.f32 %v2371_v38, 0.0 }
 0x209   : > { %v1062_v28 = vmul.f32 -2.0, %v1030_v22 }
 0x20a   : > { %v1475_v29 = vadd.f32 %v1443_v24, %v995_v23 }
 0x20b   : > { %v1980_v31 = vpop.eup %1979  ;;  %v1104_v32 = vmul.f32 1.442695, %v1062_v28  ;;  %v759_v33 = vpop.f32.mrf.mxu3 }
 0x20c   : > { %v1982_v34 = vpop.eup %1981  ;;  %v1507_v35 = vsub.f32 0.0, %v1475_v29  ;;  %v1229_v37 = vadd.f32 1.0, %v1980_v31  ;;  %v1232_v39 = vmul.f32 -0.5, %v1980_v31  ;;  %v935_v40 = vpop.f32.mrf.mxu2  ;;  %v760_v14 = vadd.f32 %v2239_v27, %v759_v33 }
 0x20d   : > { %v1222_v41 = vmul.f32 0.6931472, %v1982_v34  ;;  %1985 = vpow2.f32 %v1104_v32  ;;  %v2381_v42 = vadd.f32 %v2293_v13, %v935_v40  ;;  %v1984_v47 = vpop.eup %1983  ;;  %v1235_v51 = vand.u32 2147483647, %v1980_v31 }
 0x20e   : > { %1540 = vst.msk [vmem:[%s2318_s14 + $0x38] sm:$0xff] %vm1532_vm3, %v1507_v35  ;;  %1987 = vlog2.f32 %v1229_v37  ;;  %v1233_v48 = vadd.f32 1.0, %v1232_v39 }
 0x20f   : > { %v1228_v43 = vsel %vm1227_vm11, %v1225_v36, %v1222_v41  ;;  %1989 = vtanh.f32 %v760_v14  ;;  %v1031_v44 = vand.u32 2147483647, %v2381_v42  ;;  %vm1236_vm12 = vcmp.lt.f32.partialorder %v1235_v51, 0.0004427343 }
 0x210   : > { %v1444_v46 = vmul.f32 0.5, %v1228_v43  ;;  %v1234_v63 = vmul.f32 %v1980_v31, %v1233_v48 }
 0x211   : > { %v1063_v49 = vmul.f32 -2.0, %v1031_v44 }
 0x212   : > { %v1476_v50 = vadd.f32 %v1444_v46, %v996_v45 }
 0x213   : > { %v1986_v52 = vpop.eup %1985  ;;  %v1106_v53 = vmul.f32 1.442695, %v1063_v49  ;;  %v762_v55 = vpop.f32.mrf.mxu3 }
 0x214   : > { %v1988_v56 = vpop.eup %1987  ;;  %v1508_v57 = vsub.f32 0.0, %v1476_v50  ;;  %v1238_v58 = vadd.f32 1.0, %v1986_v52  ;;  %v1241_v59 = vmul.f32 -0.5, %v1986_v52  ;;  %v938_v25 = vpop.f32.mrf.mxu2  ;;  %v763_v1 = vadd.f32 %v2239_v27, %v762_v55 }
 0x215   : > { %v1990_v61 = vpop.eup %1989  ;;  %v1231_v62 = vmul.f32 0.6931472, %v1988_v56  ;;  %1991 = vpow2.f32 %v1106_v53  ;;  %v2388_v11 = vadd.f32 %v2293_v13, %v938_v25  ;;  %v1244_v8 = vand.u32 2147483647, %v1986_v52 }
 0x216   : > { %1541 = vst.msk [vmem:[%s2318_s14 + $0x40] sm:$0xff] %vm1532_vm3, %v1508_v57  ;;  %1993 = vlog2.f32 %v1238_v58  ;;  %v813_v15 = vpack.c.bf16 %v1990_v61, %v1984_v47  ;;  %v1242_v5 = vadd.f32 1.0, %v1241_v59  ;;  %v999_v47 = vmax.f32 %v2381_v42, 0.0 }
 0x217   : > { %v1237_v0 = vsel %vm1236_vm12, %v1234_v63, %v1231_v62  ;;  %v1032_v2 = vand.u32 2147483647, %v2388_v11  ;;  %1995 = vtanh.f32 %v763_v1  ;;  %vm1245_vm13 = vcmp.lt.f32.partialorder %v1244_v8, 0.0004427343 }
 0x218   : > { %v1445_v4 = vmul.f32 0.5, %v1237_v0  ;;  %1776 = vmatmul.msk.bf16.gmra.mxu3 %vm629_vm1, %v813_v15  ;;  %v1243_v17 = vmul.f32 %v1986_v52, %v1242_v5  ;;  %v1000_v0 = vmax.f32 %v2388_v11, 0.0 }
 0x219   : > { %v1064_v6 = vmul.f32 -2.0, %v1032_v2 }
 0x21a   : > { %v1477_v7 = vadd.f32 %v1445_v4, %v997_v3 }
 0x21b   : > { %v1992_v9 = vpop.eup %1991  ;;  %v1108_v10 = vmul.f32 1.442695, %v1064_v6  ;;  %v764_v12 = vpop.f32.mrf.mxu3 }
 0x21c   : > { %v1994_v54 = vpop.eup %1993  ;;  %v1509_v16 = vsub.f32 0.0, %v1477_v7  ;;  %v1247_v18 = vadd.f32 1.0, %v1992_v9  ;;  %v1250_v19 = vmul.f32 -0.5, %v1992_v9  ;;  %v940_v20 = vpop.f32.mrf.mxu2  ;;  %v765_v60 = vadd.f32 %v2239_v27, %v764_v12 }
 0x21d   : > { %v1240_v21 = vmul.f32 0.6931472, %v1994_v54  ;;  %1997 = vpow2.f32 %v1108_v10  ;;  %v2398_v22 = vadd.f32 %v2293_v13, %v940_v20  ;;  %v1996_v29 = vpop.eup %1995  ;;  %v1253_v27 = vand.u32 2147483647, %v1992_v9 }
 0x21e   : > { %1542 = vst.msk [vmem:[%s2318_s14 + $0x48] sm:$0xff] %vm1532_vm3, %v1509_v16  ;;  %1999 = vlog2.f32 %v1247_v18  ;;  %v1251_v30 = vadd.f32 1.0, %v1250_v19 }
 0x21f   : > { %v1246_v23 = vsel %vm1245_vm13, %v1243_v17, %v1240_v21  ;;  %2001 = vtanh.f32 %v765_v60  ;;  %v1033_v24 = vand.u32 2147483647, %v2398_v22  ;;  %vm1254_vm14 = vcmp.lt.f32.partialorder %v1253_v27, 0.0004427343 }
 0x220   : > { %v1446_v28 = vmul.f32 0.5, %v1246_v23  ;;  %v1252_v43 = vmul.f32 %v1992_v9, %v1251_v30  ;;  %v1001_v20 = vmax.f32 %v2398_v22, 0.0 }
 0x221   : > { %v1065_v31 = vmul.f32 -2.0, %v1033_v24 }
 0x222   : > { %v1478_v32 = vadd.f32 %v1446_v28, %v998_v26 }
 0x223   : > { %v1998_v33 = vpop.eup %1997  ;;  %v1110_v34 = vmul.f32 1.442695, %v1065_v31 }
 0x224   : > { %v2000_v35 = vpop.eup %1999  ;;  %v1510_v36 = vsub.f32 0.0, %v1478_v32  ;;  %v1256_v37 = vadd.f32 1.0, %v1998_v33  ;;  %v1259_v39 = vmul.f32 -0.5, %v1998_v33  ;;  %v943_v40 = vpop.f32.mrf.mxu2  ;;  %v1262_v52 = vand.u32 2147483647, %v1998_v33 }
 0x225   : > { %v2002_v41 = vpop.eup %2001  ;;  %v1249_v14 = vmul.f32 0.6931472, %v2000_v35  ;;  %2003 = vpow2.f32 %v1110_v34  ;;  %v2405_v38 = vadd.f32 %v2293_v13, %v943_v40 }
 0x226   : > { %1543 = vst.msk [vmem:[%s2318_s14 + $0x50] sm:$0xff] %vm1532_vm3, %v1510_v36  ;;  %2005 = vlog2.f32 %v1256_v37  ;;  %v814_v44 = vpack.c.bf16 %v2002_v41, %v1996_v29  ;;  %v1260_v49 = vadd.f32 1.0, %v1259_v39  ;;  %vm1263_vm15 = vcmp.lt.f32.partialorder %v1262_v52, 0.0004427343 }
 0x227   : > { %v1255_v45 = vsel %vm1254_vm14, %v1252_v43, %v1249_v14  ;;  %v1034_v46 = vand.u32 2147483647, %v2405_v38  ;;  %v1002_v39 = vmax.f32 %v2405_v38, 0.0 }
 0x228   : > { %v1447_v48 = vmul.f32 0.5, %v1255_v45  ;;  %1777 = vmatmul.msk.bf16.gmra.mxu3 %vm629_vm1, %v814_v44  ;;  %v1261_v58 = vmul.f32 %v1998_v33, %v1260_v49 }
 0x229   : > { %v1066_v50 = vmul.f32 -2.0, %v1034_v46 }
 0x22a   : > { %v1479_v51 = vadd.f32 %v1447_v48, %v999_v47 }
 0x22b   : > { %v2004_v53 = vpop.eup %2003  ;;  %v1112_v55 = vmul.f32 1.442695, %v1066_v50 }
 0x22c   : > { %v2006_v56 = vpop.eup %2005  ;;  %v1511_v57 = vsub.f32 0.0, %v1479_v51  ;;  %v1265_v59 = vadd.f32 1.0, %v2004_v53  ;;  %v945_v25 = vpop.f32.mrf.mxu2  ;;  %v1268_v62 = vmul.f32 -0.5, %v2004_v53  ;;  %v1271_v5 = vand.u32 2147483647, %v2004_v53 }
 0x22d   : > { %v1258_v61 = vmul.f32 0.6931472, %v2006_v56  ;;  %2007 = vpow2.f32 %v1112_v55  ;;  %v2413_v42 = vadd.f32 %v2293_v13, %v945_v25 }
 0x22e   : > { %1544 = vst.msk [vmem:[%s2318_s14 + $0x58] sm:$0xff] %vm1532_vm3, %v1511_v57  ;;  %2009 = vlog2.f32 %v1265_v59  ;;  %v1269_v2 = vadd.f32 1.0, %v1268_v62  ;;  %vm1272_vm0 = vcmp.lt.f32.partialorder %v1271_v5, 0.0004427343 }
 0x22f   : > { %v1264_v63 = vsel %vm1263_vm15, %v1261_v58, %v1258_v61  ;;  %v1035_v15 = vand.u32 2147483647, %v2413_v42  ;;  %v1003_v57 = vmax.f32 %v2413_v42, 0.0 }
 0x230   : > { %v1448_v1 = vmul.f32 0.5, %v1264_v63  ;;  %v1270_v17 = vmul.f32 %v2004_v53, %v1269_v2 }
 0x231   : > { %v1067_v3 = vmul.f32 -2.0, %v1035_v15 }
 0x232   : > { %v1480_v4 = vadd.f32 %v1448_v1, %v1000_v0 }
 0x233   : > { %v2008_v6 = vpop.eup %2007  ;;  %v1114_v7 = vmul.f32 1.442695, %v1067_v3 }
 0x234   : > { %v2010_v8 = vpop.eup %2009  ;;  %v1512_v9 = vsub.f32 0.0, %v1480_v4  ;;  %v1274_v10 = vadd.f32 1.0, %v2008_v6  ;;  %v1277_v12 = vmul.f32 -0.5, %v2008_v6  ;;  %v948_v54 = vpop.f32.mrf.mxu2  ;;  %v1280_v26 = vand.u32 2147483647, %v2008_v6 }
 0x235   : > { %v1267_v16 = vmul.f32 0.6931472, %v2010_v8  ;;  %2011 = vpow2.f32 %v1114_v7  ;;  %v2420_v18 = vadd.f32 %v2293_v13, %v948_v54 }
 0x236   : > { %1545 = vst.msk [vmem:[%s2318_s14 + $0x60] sm:$0xff] %vm1532_vm3, %v1512_v9  ;;  %2013 = vlog2.f32 %v1274_v10  ;;  %v1278_v60 = vadd.f32 1.0, %v1277_v12  ;;  %vm1281_vm1 = vcmp.lt.f32.partialorder %v1280_v26, 0.0004427343 }
 0x237   : > { %v1273_v11 = vsel %vm1272_vm0, %v1270_v17, %v1267_v16  ;;  %v1036_v19 = vand.u32 2147483647, %v2420_v18  ;;  %v1004_v9 = vmax.f32 %v2420_v18, 0.0 }
 0x238   : > { %v1449_v21 = vmul.f32 0.5, %v1273_v11  ;;  %v1279_v32 = vmul.f32 %v2008_v6, %v1278_v60 }
 0x239   : > { %v1068_v23 = vmul.f32 -2.0, %v1036_v19 }
 0x23a   : > { %v1481_v24 = vadd.f32 %v1449_v21, %v1001_v20 }
 0x23b   : > { %v2012_v28 = vpop.eup %2011  ;;  %v1116_v29 = vmul.f32 1.442695, %v1068_v23 }
 0x23c   : > { %v2014_v30 = vpop.eup %2013  ;;  %v1513_v31 = vsub.f32 0.0, %v1481_v24  ;;  %v1283_v27 = vadd.f32 1.0, %v2012_v28  ;;  %v950_v33 = vpop.f32.mrf.mxu2  ;;  %v1286_v35 = vmul.f32 -0.5, %v2012_v28  ;;  %v1289_v44 = vand.u32 2147483647, %v2012_v28 }
 0x23d   : > { %v1276_v34 = vmul.f32 0.6931472, %v2014_v30  ;;  %2015 = vpow2.f32 %v1116_v29  ;;  %v2427_v36 = vadd.f32 %v2293_v13, %v950_v33 }
 0x23e   : > { %1546 = vst.msk [vmem:[%s2318_s14 + $0x68] sm:$0xff] %vm1532_vm3, %v1513_v31  ;;  %2017 = vlog2.f32 %v1283_v27  ;;  %v1287_v41 = vadd.f32 1.0, %v1286_v35  ;;  %vm1290_vm2 = vcmp.lt.f32.partialorder %v1289_v44, 0.0004427343 }
 0x23f   : > { %v1282_v22 = vsel %vm1281_vm1, %v1279_v32, %v1276_v34  ;;  %v1037_v37 = vand.u32 2147483647, %v2427_v36  ;;  %v1005_v31 = vmax.f32 %v2427_v36, 0.0 }
 0x240   : > { %v1450_v40 = vmul.f32 0.5, %v1282_v22  ;;  %v1288_v53 = vmul.f32 %v2012_v28, %v1287_v41 }
 0x241   : > { %v1069_v14 = vmul.f32 -2.0, %v1037_v37 }
 0x242   : > { %v1482_v43 = vadd.f32 %v1450_v40, %v1002_v39 }
 0x243   : > { %v2016_v45 = vpop.eup %2015  ;;  %v1118_v46 = vmul.f32 1.442695, %v1069_v14 }
 0x244   : > { %v2018_v47 = vpop.eup %2017  ;;  %v1514_v48 = vsub.f32 0.0, %v1482_v43  ;;  %v1292_v49 = vadd.f32 1.0, %v2016_v45  ;;  %v1295_v50 = vmul.f32 -0.5, %v2016_v45  ;;  %v953_v51 = vpop.f32.mrf.mxu2  ;;  %v1298_v62 = vand.u32 2147483647, %v2016_v45 }
 0x245   : > { %v1285_v52 = vmul.f32 0.6931472, %v2018_v47  ;;  %2019 = vpow2.f32 %v1118_v46  ;;  %v2434_v55 = vadd.f32 %v2293_v13, %v953_v51 }
 0x246   : > { %1547 = vst.msk [vmem:[%s2318_s14 + $0x70] sm:$0xff] %vm1532_vm3, %v1514_v48  ;;  %2021 = vlog2.f32 %v1292_v49  ;;  %v1296_v59 = vadd.f32 1.0, %v1295_v50  ;;  %vm1299_vm4 = vcmp.lt.f32.partialorder %v1298_v62, 0.0004427343 }
 0x247   : > { %v1291_v38 = vsel %vm1290_vm2, %v1288_v53, %v1285_v52  ;;  %v1038_v56 = vand.u32 2147483647, %v2434_v55  ;;  %v1006_v48 = vmax.f32 %v2434_v55, 0.0  ;;  %v2464_v55 = vld [vmem:[%s2548_s6] ss:$0 sm:$0xff] }
 0x248   : > { %v1451_v58 = vmul.f32 0.5, %v1291_v38  ;;  %v1297_v2 = vmul.f32 %v2016_v45, %v1296_v59 }
 0x249   : > { %v1070_v25 = vmul.f32 -2.0, %v1038_v56 }
 0x24a   : > { %v1483_v61 = vadd.f32 %v1451_v58, %v1003_v57 }
 0x24b   : > { %v2020_v63 = vpop.eup %2019  ;;  %v1120_v15 = vmul.f32 1.442695, %v1070_v25 }
 0x24c   : > { %v2022_v0 = vpop.eup %2021  ;;  %v1515_v1 = vsub.f32 0.0, %v1483_v61  ;;  %v1301_v3 = vadd.f32 1.0, %v2020_v63  ;;  %v955_v4 = vpop.f32.mrf.mxu2  ;;  %v1304_v6 = vmul.f32 -0.5, %v2020_v63  ;;  %v1307_v17 = vand.u32 2147483647, %v2020_v63 }
 0x24d   : > { %v1294_v5 = vmul.f32 0.6931472, %v2022_v0  ;;  %2023 = vpow2.f32 %v1120_v15  ;;  %v2441_v7 = vadd.f32 %v2293_v13, %v955_v4 }
 0x24e   : > { %1548 = vst.msk [vmem:[%s2318_s14 + $0x78] sm:$0xff] %vm1532_vm3, %v1515_v1  ;;  %2025 = vlog2.f32 %v1301_v3  ;;  %v1305_v12 = vadd.f32 1.0, %v1304_v6  ;;  %vm1308_vm5 = vcmp.lt.f32.partialorder %v1307_v17, 0.0004427343 }
 0x24f   : > { %v1300_v42 = vsel %vm1299_vm4, %v1297_v2, %v1294_v5  ;;  %v1039_v8 = vand.u32 2147483647, %v2441_v7  ;;  %v1007_v1 = vmax.f32 %v2441_v7, 0.0 }
 0x250   : > { %v1452_v10 = vmul.f32 0.5, %v1300_v42  ;;  %v1306_v28 = vmul.f32 %v2020_v63, %v1305_v12 }
 0x251   : > { %v1071_v54 = vmul.f32 -2.0, %v1039_v8 }
 0x252   : > { %v1484_v16 = vadd.f32 %v1452_v10, %v1004_v9 }
 0x253   : > { %v2024_v11 = vpop.eup %2023  ;;  %v1122_v19 = vmul.f32 1.442695, %v1071_v54 }
 0x254   : > { %v2026_v20 = vpop.eup %2025  ;;  %v1516_v21 = vsub.f32 0.0, %v1484_v16  ;;  %v1310_v60 = vadd.f32 1.0, %v2024_v11  ;;  %v1313_v23 = vmul.f32 -0.5, %v2024_v11  ;;  %v958_v24 = vpop.f32.mrf.mxu2  ;;  %v1316_v35 = vand.u32 2147483647, %v2024_v11 }
 0x255   : > { %v1303_v26 = vmul.f32 0.6931472, %v2026_v20  ;;  %2027 = vpow2.f32 %v1122_v19  ;;  %v2448_v29 = vadd.f32 %v2293_v13, %v958_v24 }
 0x256   : > { %1549 = vst.msk [vmem:[%s2318_s14 + $0x80] sm:$0xff] %vm1532_vm3, %v1516_v21  ;;  %2029 = vlog2.f32 %v1310_v60  ;;  %v1314_v27 = vadd.f32 1.0, %v1313_v23  ;;  %vm1317_vm6 = vcmp.lt.f32.partialorder %v1316_v35, 0.0004427343 }
 0x257   : > { %v1309_v18 = vsel %vm1308_vm5, %v1306_v28, %v1303_v26  ;;  %v1040_v30 = vand.u32 2147483647, %v2448_v29  ;;  %v1008_v21 = vmax.f32 %v2448_v29, 0.0 }
 0x258   : > { %v1453_v32 = vmul.f32 0.5, %v1309_v18  ;;  %v1315_v41 = vmul.f32 %v2024_v11, %v1314_v27 }
 0x259   : > { %v1072_v33 = vmul.f32 -2.0, %v1040_v30 }
 0x25a   : > { %v1485_v34 = vadd.f32 %v1453_v32, %v1005_v31 }
 0x25b   : > { %v2028_v22 = vpop.eup %2027  ;;  %v1124_v37 = vmul.f32 1.442695, %v1072_v33 }
 0x25c   : > { %v2030_v39 = vpop.eup %2029  ;;  %v1517_v40 = vsub.f32 0.0, %v1485_v34  ;;  %v1319_v14 = vadd.f32 1.0, %v2028_v22  ;;  %v960_v43 = vpop.f32.mrf.mxu2  ;;  %v1322_v45 = vmul.f32 -0.5, %v2028_v22  ;;  %v1325_v53 = vand.u32 2147483647, %v2028_v22 }
 0x25d   : > { %v1312_v44 = vmul.f32 0.6931472, %v2030_v39  ;;  %2031 = vpow2.f32 %v1124_v37  ;;  %v2455_v46 = vadd.f32 %v2293_v13, %v960_v43 }
 0x25e   : > { %1550 = vst.msk [vmem:[%s2318_s14 + $0x88] sm:$0xff] %vm1532_vm3, %v1517_v40  ;;  %2033 = vlog2.f32 %v1319_v14  ;;  %v1323_v50 = vadd.f32 1.0, %v1322_v45  ;;  %vm1326_vm7 = vcmp.lt.f32.partialorder %v1325_v53, 0.0004427343 }
 0x25f   : > { %v1318_v36 = vsel %vm1317_vm6, %v1315_v41, %v1312_v44  ;;  %v1041_v47 = vand.u32 2147483647, %v2455_v46 }
 0x260   : > { %v1454_v49 = vmul.f32 0.5, %v1318_v36  ;;  %v1324_v62 = vmul.f32 %v2028_v22, %v1323_v50  ;;  %v1009_v22 = vmax.f32 %v2455_v46, 0.0 }
 0x261   : > { %v1073_v51 = vmul.f32 -2.0, %v1041_v47 }
 0x262   : > { %v1486_v52 = vadd.f32 %v1454_v49, %v1006_v48 }
 0x263   : > { %v2032_v38 = vpop.eup %2031  ;;  %v1126_v56 = vmul.f32 1.442695, %v1073_v51 }
 0x264   : > { %v2034_v57 = vpop.eup %2033  ;;  %v1518_v13 = vsub.f32 0.0, %v1486_v52  ;;  %v1328_v58 = vadd.f32 1.0, %v2032_v38  ;;  %v1331_v59 = vmul.f32 -0.5, %v2032_v38  ;;  %v963_v25 = vpop.f32.mrf.mxu2  ;;  %v1334_v6 = vand.u32 2147483647, %v2032_v38 }
 0x265   : > { %v1321_v61 = vmul.f32 0.6931472, %v2034_v57  ;;  %2035 = vpow2.f32 %v1126_v56  ;;  %v2467_v63 = vadd.f32 %v2464_v55, %v963_v25 }
 0x266   : > { %1551 = vst.msk [vmem:[%s2318_s14 + $0x90] sm:$0xff] %vm1532_vm3, %v1518_v13  ;;  %2037 = vlog2.f32 %v1328_v58  ;;  %v1332_v3 = vadd.f32 1.0, %v1331_v59  ;;  %vm1335_vm8 = vcmp.lt.f32.partialorder %v1334_v6, 0.0004427343 }
 0x267   : > { %v1327_v15 = vsel %vm1326_vm7, %v1324_v62, %v1321_v61  ;;  %v1042_v0 = vand.u32 2147483647, %v2467_v63  ;;  %v1010_v52 = vmax.f32 %v2467_v63, 0.0 }
 0x268   : > { %v1455_v2 = vmul.f32 0.5, %v1327_v15  ;;  %v1333_v12 = vmul.f32 %v2032_v38, %v1332_v3 }
 0x269   : > { %v1074_v4 = vmul.f32 -2.0, %v1042_v0 }
 0x26a   : > { %v1487_v5 = vadd.f32 %v1455_v2, %v1007_v1 }
 0x26b   : > { %v2036_v42 = vpop.eup %2035  ;;  %v1128_v8 = vmul.f32 1.442695, %v1074_v4 }
 0x26c   : > { %v2038_v9 = vpop.eup %2037  ;;  %v1519_v10 = vsub.f32 0.0, %v1487_v5  ;;  %v1337_v54 = vadd.f32 1.0, %v2036_v42  ;;  %v965_v16 = vpop.f32.mrf.mxu2  ;;  %v1340_v11 = vmul.f32 -0.5, %v2036_v42  ;;  %v1343_v28 = vand.u32 2147483647, %v2036_v42 }
 0x26d   : > { %v1330_v17 = vmul.f32 0.6931472, %v2038_v9  ;;  %2039 = vpow2.f32 %v1128_v8  ;;  %v2474_v19 = vadd.f32 %v2464_v55, %v965_v16 }
 0x26e   : > { %1552 = vst.msk [vmem:[%s2318_s14 + $0x98] sm:$0xff] %vm1532_vm3, %v1519_v10  ;;  %2041 = vlog2.f32 %v1337_v54  ;;  %v1341_v23 = vadd.f32 1.0, %v1340_v11  ;;  %vm1344_vm9 = vcmp.lt.f32.partialorder %v1343_v28, 0.0004427343 }
 0x26f   : > { %v1336_v7 = vsel %vm1335_vm8, %v1333_v12, %v1330_v17  ;;  %v1043_v20 = vand.u32 2147483647, %v2474_v19  ;;  %v1011_v2 = vmax.f32 %v2474_v19, 0.0 }
 0x270   : > { %v1456_v60 = vmul.f32 0.5, %v1336_v7  ;;  %v1342_v34 = vmul.f32 %v2036_v42, %v1341_v23 }
 0x271   : > { %v1075_v24 = vmul.f32 -2.0, %v1043_v20 }
 0x272   : > { %v1488_v26 = vadd.f32 %v1456_v60, %v1008_v21 }
 0x273   : > { %v2040_v18 = vpop.eup %2039  ;;  %v1130_v30 = vmul.f32 1.442695, %v1075_v24 }
 0x274   : > { %v2042_v31 = vpop.eup %2041  ;;  %v1520_v32 = vsub.f32 0.0, %v1488_v26  ;;  %v1346_v27 = vadd.f32 1.0, %v2040_v18  ;;  %v1349_v35 = vmul.f32 -0.5, %v2040_v18  ;;  %v1352_v41 = vand.u32 2147483647, %v2040_v18 }
 0x275   : > { %v1339_v33 = vmul.f32 0.6931472, %v2042_v31  ;;  %2043 = vpow2.f32 %v1130_v30 }
 0x276   : > { %1553 = vst.msk [vmem:[%s2318_s14 + $0xa0] sm:$0xff] %vm1532_vm3, %v1520_v32  ;;  %2045 = vlog2.f32 %v1346_v27  ;;  %v1350_v39 = vadd.f32 1.0, %v1349_v35  ;;  %vm1353_vm10 = vcmp.lt.f32.partialorder %v1352_v41, 0.0004427343 }
 0x277   : > { %v1345_v29 = vsel %vm1344_vm9, %v1342_v34, %v1339_v33 }
 0x278   : > { %v1457_v37 = vmul.f32 0.5, %v1345_v29  ;;  %v1351_v48 = vmul.f32 %v2040_v18, %v1350_v39 }
 0x27a   : > { %v1489_v40 = vadd.f32 %v1457_v37, %v1009_v22 }
 0x27b   : > { %v2044_v14 = vpop.eup %2043  ;;  %v968_v43 = vpop.f32.mrf.mxu3 }
 0x27c   : > { %v2046_v44 = vpop.eup %2045  ;;  %v1521_v45 = vsub.f32 0.0, %v1489_v40  ;;  %v1355_v36 = vadd.f32 1.0, %v2044_v14  ;;  %v1358_v49 = vmul.f32 -0.5, %v2044_v14  ;;  %v969_v50 = vadd.f32 %v2464_v55, %v968_v43 }
 0x27d   : > { %v1348_v47 = vmul.f32 0.6931472, %v2046_v44  ;;  %v1361_v13 = vand.u32 2147483647, %v2044_v14 }
 0x27e   : > { %1554 = vst.msk [vmem:[%s2318_s14 + $0xa8] sm:$0xff] %vm1532_vm3, %v1521_v45  ;;  %2047 = vlog2.f32 %v1355_v36  ;;  %v1044_v46 = vand.u32 2147483647, %v969_v50  ;;  %v1359_v38 = vadd.f32 1.0, %v1358_v49  ;;  %v1012_v32 = vmax.f32 %v969_v50, 0.0 }
 0x27f   : > { %v1354_v51 = vsel %vm1353_vm10, %v1351_v48, %v1348_v47  ;;  %vm1362_vm11 = vcmp.lt.f32.partialorder %v1361_v13, 0.0004427343 }
 0x280   : > { %v1458_v53 = vmul.f32 0.5, %v1354_v51  ;;  %v1076_v56 = vmul.f32 -2.0, %v1044_v46  ;;  %v1360_v0 = vmul.f32 %v2044_v14, %v1359_v38 }
 0x282   : > { %v1490_v57 = vadd.f32 %v1458_v53, %v1010_v52  ;;  %v1132_v58 = vmul.f32 1.442695, %v1076_v56 }
 0x283   : > { %v970_v59 = vpop.f32.mrf.mxu3 }
 0x284   : > { %v2048_v25 = vpop.eup %2047  ;;  %v1522_v61 = vsub.f32 0.0, %v1490_v57  ;;  %v2488_v62 = vadd.f32 %v2464_v55, %v970_v59  ;;  %2049 = vpow2.f32 %v1132_v58 }
 0x285   : > { %v1357_v15 = vmul.f32 0.6931472, %v2048_v25 }
 0x286   : > { %1555 = vst.msk [vmem:[%s2318_s14 + $0xb0] sm:$0xff] %vm1532_vm3, %v1522_v61  ;;  %v1045_v63 = vand.u32 2147483647, %v2488_v62  ;;  %v1013_v49 = vmax.f32 %v2488_v62, 0.0 }
 0x287   : > { %v1363_v1 = vsel %vm1362_vm11, %v1360_v0, %v1357_v15 }
 0x288   : > { %v1459_v3 = vmul.f32 0.5, %v1363_v1  ;;  %v1077_v4 = vmul.f32 -2.0, %v1045_v63 }
 0x28a   : > { %v1491_v5 = vadd.f32 %v1459_v3, %v1011_v2  ;;  %v1134_v6 = vmul.f32 1.442695, %v1077_v4  ;;  %v2050_v42 = vpop.eup %2049 }
 0x28b   : > { %v973_v8 = vpop.f32.mrf.mxu3  ;;  %v1364_v10 = vadd.f32 1.0, %v2050_v42  ;;  %v1367_v12 = vmul.f32 -0.5, %v2050_v42  ;;  %v1370_v19 = vand.u32 2147483647, %v2050_v42 }
 0x28c   : > { %v1523_v9 = vsub.f32 0.0, %v1491_v5  ;;  %2051 = vpow2.f32 %v1134_v6  ;;  %v2495_v54 = vadd.f32 %v2464_v55, %v973_v8 }
 0x28d   : > { %2053 = vlog2.f32 %v1364_v10  ;;  %v1368_v17 = vadd.f32 1.0, %v1367_v12  ;;  %vm1371_vm12 = vcmp.lt.f32.partialorder %v1370_v19, 0.0004427343 }
 0x28e   : > { %1556 = vst.msk [vmem:[%s2318_s14 + $0xb8] sm:$0xff] %vm1532_vm3, %v1523_v9  ;;  %v1046_v16 = vand.u32 2147483647, %v2495_v54  ;;  %v1014_v1 = vmax.f32 %v2495_v54, 0.0 }
 0x28f   : > { %v1369_v28 = vmul.f32 %v2050_v42, %v1368_v17 }
 0x290   : > { %v1078_v11 = vmul.f32 -2.0, %v1046_v16 }
 0x292   : > { %v2052_v7 = vpop.eup %2051  ;;  %v1136_v20 = vmul.f32 1.442695, %v1078_v11 }
 0x293   : > { %v975_v21 = vpop.f32.mrf.mxu3  ;;  %v2054_v60 = vpop.eup %2053  ;;  %v1373_v23 = vadd.f32 1.0, %v2052_v7  ;;  %v1376_v18 = vmul.f32 -0.5, %v2052_v7  ;;  %v1379_v29 = vand.u32 2147483647, %v2052_v7 }
 0x294   : > { %v2501_v24 = vadd.f32 %v2464_v55, %v975_v21  ;;  %v1366_v26 = vmul.f32 0.6931472, %v2054_v60  ;;  %2055 = vpow2.f32 %v1136_v20 }
 0x295   : > { %2057 = vlog2.f32 %v1373_v23  ;;  %v1377_v33 = vadd.f32 1.0, %v1376_v18  ;;  %vm1380_vm13 = vcmp.lt.f32.partialorder %v1379_v29, 0.0004427343 }
 0x296   : > { %v1372_v30 = vsel %vm1371_vm12, %v1369_v28, %v1366_v26  ;;  %v1047_v31 = vand.u32 2147483647, %v2501_v24  ;;  %v1015_v21 = vmax.f32 %v2501_v24, 0.0 }
 0x297   : > { %v1460_v27 = vmul.f32 0.5, %v1372_v30  ;;  %v1378_v45 = vmul.f32 %v2052_v7, %v1377_v33 }
 0x298   : > { %v1079_v34 = vmul.f32 -2.0, %v1047_v31 }
 0x299   : > { %v1492_v35 = vadd.f32 %v1460_v27, %v1012_v32 }
 0x29a   : > { %v2056_v22 = vpop.eup %2055  ;;  %v1138_v37 = vmul.f32 1.442695, %v1079_v34 }
 0x29b   : > { %v978_v39 = vpop.f32.mrf.mxu3  ;;  %v2058_v40 = vpop.eup %2057  ;;  %v1524_v41 = vsub.f32 0.0, %v1492_v35  ;;  %v1382_v14 = vadd.f32 1.0, %v2056_v22  ;;  %v1385_v43 = vmul.f32 -0.5, %v2056_v22  ;;  %v1388_v53 = vand.u32 2147483647, %v2056_v22 }
 0x29c   : > { %v1375_v44 = vmul.f32 0.6931472, %v2058_v40  ;;  %2059 = vpow2.f32 %v1138_v37  ;;  %v2505_v36 = vadd.f32 %v2464_v55, %v978_v39 }
 0x29d   : > { %1557 = vst.msk [vmem:[%s2318_s14 + $0xc0] sm:$0xff] %vm1532_vm3, %v1524_v41  ;;  %2061 = vlog2.f32 %v1382_v14  ;;  %v1386_v51 = vadd.f32 1.0, %v1385_v43  ;;  %vm1389_vm14 = vcmp.lt.f32.partialorder %v1388_v53, 0.0004427343 }
 0x29e   : > { %v1381_v47 = vsel %vm1380_vm13, %v1378_v45, %v1375_v44  ;;  %v1048_v48 = vand.u32 2147483647, %v2505_v36  ;;  %v1016_v40 = vmax.f32 %v2505_v36, 0.0 }
 0x29f   : > { %v1461_v50 = vmul.f32 0.5, %v1381_v47  ;;  %v1387_v59 = vmul.f32 %v2056_v22, %v1386_v51 }
 0x2a0   : > { %v1080_v46 = vmul.f32 -2.0, %v1048_v48 }
 0x2a1   : > { %v1493_v52 = vadd.f32 %v1461_v50, %v1013_v49 }
 0x2a2   : > { %v2060_v38 = vpop.eup %2059  ;;  %v1140_v56 = vmul.f32 1.442695, %v1080_v46 }
 0x2a3   : > { %v980_v57 = vpop.f32.mrf.mxu3  ;;  %v2062_v13 = vpop.eup %2061  ;;  %v1525_v58 = vsub.f32 0.0, %v1493_v52  ;;  %v1391_v25 = vadd.f32 1.0, %v2060_v38  ;;  %v1394_v15 = vmul.f32 -0.5, %v2060_v38  ;;  %v1397_v6 = vand.u32 2147483647, %v2060_v38 }
 0x2a4   : > { %v1384_v61 = vmul.f32 0.6931472, %v2062_v13  ;;  %2063 = vpow2.f32 %v1140_v56  ;;  %v2512_v0 = vadd.f32 %v2464_v55, %v980_v57 }
 0x2a5   : > { %1558 = vst.msk [vmem:[%s2318_s14 + $0xc8] sm:$0xff] %vm1532_vm3, %v1525_v58  ;;  %2065 = vlog2.f32 %v1391_v25  ;;  %v1395_v3 = vadd.f32 1.0, %v1394_v15  ;;  %vm1398_vm15 = vcmp.lt.f32.partialorder %v1397_v6, 0.0004427343 }
 0x2a6   : > { %v1390_v62 = vsel %vm1389_vm14, %v1387_v59, %v1384_v61  ;;  %v1049_v63 = vand.u32 2147483647, %v2512_v0  ;;  %v1017_v53 = vmax.f32 %v2512_v0, 0.0 }
 0x2a7   : > { %v1462_v2 = vmul.f32 0.5, %v1390_v62  ;;  %v1396_v19 = vmul.f32 %v2060_v38, %v1395_v3 }
 0x2a8   : > { %v1081_v4 = vmul.f32 -2.0, %v1049_v63 }
 0x2a9   : > { %v1494_v5 = vadd.f32 %v1462_v2, %v1014_v1 }
 0x2aa   : > { %v2064_v42 = vpop.eup %2063  ;;  %v1142_v8 = vmul.f32 1.442695, %v1081_v4 }
 0x2ab   : > { %v983_v9 = vpop.f32.mrf.mxu3  ;;  %v2066_v10 = vpop.eup %2065  ;;  %v1526_v12 = vsub.f32 0.0, %v1494_v5  ;;  %v1400_v16 = vadd.f32 1.0, %v2064_v42  ;;  %v1403_v17 = vmul.f32 -0.5, %v2064_v42  ;;  %v1406_v18 = vand.u32 2147483647, %v2064_v42 }
 0x2ac   : > { %v1393_v11 = vmul.f32 0.6931472, %v2066_v10  ;;  %2067 = vpow2.f32 %v1142_v8  ;;  %v2519_v7 = vadd.f32 %v2464_v55, %v983_v9 }
 0x2ad   : > { %1559 = vst.msk [vmem:[%s2318_s14 + $0xd0] sm:$0xff] %vm1532_vm3, %v1526_v12  ;;  %2069 = vlog2.f32 %v1400_v16  ;;  %v1404_v23 = vadd.f32 1.0, %v1403_v17  ;;  %vm1407_vm0 = vcmp.lt.f32.partialorder %v1406_v18, 0.0004427343 }
 0x2ae   : > { %v1399_v54 = vsel %vm1398_vm15, %v1396_v19, %v1393_v11  ;;  %v1050_v20 = vand.u32 2147483647, %v2519_v7  ;;  %v1018_v2 = vmax.f32 %v2519_v7, 0.0 }
 0x2af   : > { %v1463_v60 = vmul.f32 0.5, %v1399_v54  ;;  %v1405_v34 = vmul.f32 %v2064_v42, %v1404_v23 }
 0x2b0   : > { %v1082_v26 = vmul.f32 -2.0, %v1050_v20 }
 0x2b1   : > { %v1495_v28 = vadd.f32 %v1463_v60, %v1015_v21 }
 0x2b2   : > { %v2068_v30 = vpop.eup %2067  ;;  %v1144_v31 = vmul.f32 1.442695, %v1082_v26 }
 0x2b3   : > { %v985_v32 = vpop.f32.mrf.mxu3  ;;  %v2070_v27 = vpop.eup %2069  ;;  %v1527_v33 = vsub.f32 0.0, %v1495_v28  ;;  %v1409_v35 = vadd.f32 1.0, %v2068_v30  ;;  %v1412_v22 = vmul.f32 -0.5, %v2068_v30  ;;  %v1415_v45 = vand.u32 2147483647, %v2068_v30 }
 0x2b4   : > { %v1402_v29 = vmul.f32 0.6931472, %v2070_v27  ;;  %2071 = vpow2.f32 %v1144_v31  ;;  %v986_v37 = vadd.f32 %v2464_v55, %v985_v32 }
 0x2b5   : > { %1560 = vst.msk [vmem:[%s2318_s14 + $0xd8] sm:$0xff] %vm1532_vm3, %v1527_v33  ;;  %2073 = vlog2.f32 %v1409_v35  ;;  %v1413_v14 = vadd.f32 1.0, %v1412_v22  ;;  %vm1416_vm1 = vcmp.lt.f32.partialorder %v1415_v45, 0.0004427343 }
 0x2b6   : > { %v1408_v24 = vsel %vm1407_vm0, %v1405_v34, %v1402_v29  ;;  %v1051_v39 = vand.u32 2147483647, %v986_v37  ;;  %v1019_v12 = vmax.f32 %v986_v37, 0.0 }
 0x2b7   : > { %v1464_v41 = vmul.f32 0.5, %v1408_v24  ;;  %v1414_v46 = vmul.f32 %v2068_v30, %v1413_v14 }
 0x2b8   : > { %v1083_v43 = vmul.f32 -2.0, %v1051_v39 }
 0x2b9   : > { %v1496_v44 = vadd.f32 %v1464_v41, %v1016_v40 }
 0x2ba   : > { %v2072_v47 = vpop.eup %2071  ;;  %v1146_v48 = vmul.f32 1.442695, %v1083_v43 }
 0x2bb   : > { %v2074_v49 = vpop.eup %2073  ;;  %v1528_v50 = vsub.f32 0.0, %v1496_v44  ;;  %v1418_v51 = vadd.f32 1.0, %v2072_v47  ;;  %v1421_v52 = vmul.f32 -0.5, %v2072_v47  ;;  %v1424_v13 = vand.u32 2147483647, %v2072_v47 }
 0x2bc   : > { %v1411_v55 = vmul.f32 0.6931472, %v2074_v49  ;;  %2075 = vpow2.f32 %v1146_v48 }
 0x2bd   : > { %1561 = vst.msk [vmem:[%s2318_s14 + $0xe0] sm:$0xff] %vm1532_vm3, %v1528_v50  ;;  %2077 = vlog2.f32 %v1418_v51  ;;  %v1422_v56 = vadd.f32 1.0, %v1421_v52  ;;  %vm1425_vm2 = vcmp.lt.f32.partialorder %v1424_v13, 0.0004427343 }
 0x2be   : > { %v1417_v36 = vsel %vm1416_vm1, %v1414_v46, %v1411_v55 }
 0x2bf   : > { %v1465_v38 = vmul.f32 0.5, %v1417_v36  ;;  %v1423_v62 = vmul.f32 %v2072_v47, %v1422_v56 }
 0x2c1   : > { %v1497_v57 = vadd.f32 %v1465_v38, %v1017_v53 }
 0x2c2   : > { %v2076_v58 = vpop.eup %2075 }
 0x2c3   : > { %v2078_v59 = vpop.eup %2077  ;;  %v1529_v25 = vsub.f32 0.0, %v1497_v57  ;;  %v1427_v61 = vadd.f32 1.0, %v2076_v58  ;;  %v1430_v63 = vmul.f32 -0.5, %v2076_v58  ;;  %v1433_v5 = vand.u32 2147483647, %v2076_v58 }
 0x2c4   : > { %v1420_v15 = vmul.f32 0.6931472, %v2078_v59 }
 0x2c5   : > { %1562 = vst.msk [vmem:[%s2318_s14 + $0xe8] sm:$0xff] %vm1532_vm3, %v1529_v25  ;;  %2079 = vlog2.f32 %v1427_v61  ;;  %v1431_v3 = vadd.f32 1.0, %v1430_v63  ;;  %vm1434_vm4 = vcmp.lt.f32.partialorder %v1433_v5, 0.0004427343 }
 0x2c6   : > { %v1426_v1 = vsel %vm1425_vm2, %v1423_v62, %v1420_v15 }
 0x2c7   : > { %v1466_v0 = vmul.f32 0.5, %v1426_v1  ;;  %v1432_v9 = vmul.f32 %v2076_v58, %v1431_v3 }
 0x2c9   : > { %v1498_v4 = vadd.f32 %v1466_v0, %v1018_v2 }
 0x2cb   : > { %v2080_v6 = vpop.eup %2079  ;;  %v1530_v42 = vsub.f32 0.0, %v1498_v4 }
 0x2cc   : > { %v1429_v8 = vmul.f32 0.6931472, %v2080_v6 }
 0x2cd   : > { %1563 = vst.msk [vmem:[%s2318_s14 + $0xf0] sm:$0xff] %vm1532_vm3, %v1530_v42 }
 0x2ce   : > { %v1435_v10 = vsel %vm1434_vm4, %v1432_v9, %v1429_v8 }
 0x2cf   : > { %v1467_v16 = vmul.f32 0.5, %v1435_v10 }
 0x2d1   : > { %v1499_v17 = vadd.f32 %v1467_v16, %v1019_v12 }
 0x2d3   : > { %v1531_v11 = vsub.f32 0.0, %v1499_v17 }
 0x2d5   : > { %1564 = vst.msk [vmem:[%s2318_s14 + $0xf8] sm:$0xff] %vm1532_vm3, %v1531_v11 }
 0x2d6 PF: > { %s17_s24 = sadd.s32 1, %s2088_s24  }
 0x2d7   : > { %p14_p4 = scmp.ge.s32.totalorder %s17_s24, 4  }
 0x2d9   :  { %16 = sbr.rel (!%p14_p4) target bundleno = 1 (0x1), region = 78 }

</bundles_post_ra>
